<compile_context>
chip_gen: v7x
topology: tpu7x:2x2x1
jax: 0.10.0
libtpu: 0.0.40
codegen_flags: <defaults>
</compile_context>

<pallas_src>
import functools

import jax
import jax.numpy as jnp
from jax.experimental import pallas as pl
from jax.experimental.pallas import tpu as pltpu


def _round_up(x, m):
    return ((x + m - 1) // m) * m


# ---------------------------------------------------------------------------
# Weight preparation (adaptive mixing, modulation, demodulation) — plain XLA.
# ---------------------------------------------------------------------------
def _modulate_weights(weights, mod, kernel_mod, *, demod, eps):
    """weights: (N, Co, Ci, K, K), mod: (B, Ci), kernel_mod: (B, N) or None.
    Returns per-sample weights (B, Co, Ci, K, K) in float32."""
    b = mod.shape[0]
    w = weights.astype(jnp.float32)
    if weights.shape[0] > 1:                    # adaptive path
        assert kernel_mod is not None
        attn = jax.nn.softmax(kernel_mod.astype(jnp.float32), axis=-1)   # (B, N)
        w = jnp.einsum("bn,noikl->boikl", attn, w)                       # (B,Co,Ci,K,K)
    else:
        w = jnp.broadcast_to(w[0][None], (b,) + weights.shape[1:])
    w = w * (mod.astype(jnp.float32)[:, None, :, None, None] + 1.0)
    if demod:
        ssq = jnp.sum(w * w, axis=(2, 3, 4), keepdims=True)
        w = w * jax.lax.rsqrt(jnp.maximum(ssq, eps))
    return w


# ---------------------------------------------------------------------------
# Pallas kernel: per-sample "same" KxK conv on one row tile.
# ---------------------------------------------------------------------------
def _mod_conv_kernel(xc_ref, xh_ref, w_ref, o_ref, xbuf_ref, *, K, Wp):
    """
    xc_ref : (M, Ci)        flattened padded pixels of the current row tile
    xh_ref : (HALO, Ci)     first rows of the next tile (bottom halo)
    w_ref  : (K*K, Ci, Co)  per-sample modulated weights, tap-major
    o_ref  : (M, Co)        flat output tile (padded-width coords), f32
    xbuf   : (M+HALO, Ci)   VMEM scratch = tile + halo
    """
    M = xc_ref.shape[0]
    halo = xh_ref.shape[0]
    Co = o_ref.shape[-1]

    xbuf_ref[0:M, :] = xc_ref[...]
    xbuf_ref[M:M + halo, :] = xh_ref[...]

    acc = jnp.zeros((M, Co), jnp.float32)
    for di in range(K):
        for dj in range(K):
            s = di * Wp + dj                      # static flat shift of tap (di, dj)
            acc = acc + jnp.dot(xbuf_ref[s:s + M, :], w_ref[di * K + dj],
                                preferred_element_type=jnp.float32)
    o_ref[...] = acc.astype(o_ref.dtype)


def _mod_conv_pallas(x, w, *, n_tiles, K, Wp, halo_rows):
    """x: (B, n_tiles+1, M, Ci) compute dtype;  w: (B, K*K, Ci, Co).
    Returns (B, n_tiles, M, Co) float32 in flat padded-width coordinates."""
    B, _, M, Ci = x.shape
    _, KK, _, Co = w.shape

    kernel = functools.partial(_mod_conv_kernel, K=K, Wp=Wp)

    es_x = x.dtype.itemsize
    es_w = w.dtype.itemsize
    # double-buffered streamed blocks + resident scratch
    vmem_bytes = (2 * ((M + halo_rows) * Ci * es_x + KK * Ci * Co * es_w + M * Co * 4)
                  + (M + halo_rows) * Ci * es_x)
    vmem_limit = int(min(64 * 2**20, max(32 * 2**20, 2 * vmem_bytes)))

    cost = pl.CostEstimate(
        flops=2 * B * n_tiles * M * Ci * Co * KK,
        transcendentals=0,
        bytes_accessed=(B * n_tiles * (M + halo_rows) * Ci * es_x
                        + B * KK * Ci * Co * es_w
                        + B * n_tiles * M * Co * 4),
    )

    return pl.pallas_call(
        kernel,
        out_shape=jax.ShapeDtypeStruct((B, n_tiles, M, Co), jnp.float32),
        grid_spec=pltpu.PrefetchScalarGridSpec(
            num_scalar_prefetch=0,
            grid=(B, n_tiles),
            in_specs=[
                # current row tile (flattened padded pixels, channels on lanes)
                pl.BlockSpec((None, None, M, Ci), lambda b, i: (b, i, 0, 0)),
                # bottom halo: first rows of the next tile
                pl.BlockSpec((None, None, halo_rows, Ci), lambda b, i: (b, i + 1, 0, 0)),
                # per-sample weights, resident across the row tiles of a sample
                pl.BlockSpec((None, KK, Ci, Co), lambda b, i: (b, 0, 0, 0)),
            ],
            out_specs=pl.BlockSpec((None, None, M, Co), lambda b, i: (b, i, 0, 0)),
            scratch_shapes=[pltpu.VMEM((M + halo_rows, Ci), x.dtype)],
        ),
        compiler_params=pltpu.CompilerParams(
            dimension_semantics=("parallel", "parallel"),
            vmem_limit_bytes=vmem_limit,
        ),
        cost_estimate=cost,
    )(x, x, w)


# ---------------------------------------------------------------------------
# Public forward (NCHW in / NCHW out, matching the PyTorch module).
# ---------------------------------------------------------------------------
def adaptive_conv2d_mod_forward(fmap, weights, mod, kernel_mod=None, *,
                                demod=True, eps=1e-8, stride=1, dilation=1,
                                compute_dtype=jnp.bfloat16):
    """fmap: (B, Ci, H, W); weights: (N, Co, Ci, K, K); mod: (B, Ci);
    kernel_mod: (B, N) when N > 1."""
    B, Ci, H, W = fmap.shape
    N, Co, Ci_w, K, K2 = weights.shape
    assert Ci_w == Ci and K == K2
    # TODO(synk): only the stride=1, dilation=1, odd-K "same"-padding path used
    # by GigaGAN is implemented; general stride/dilation would need a strided
    # output index map.
    assert stride == 1 and dilation == 1 and K % 2 == 1

    w_b = _modulate_weights(weights, mod, kernel_mod, demod=demod, eps=eps)
    # Tap-major (K*K, Ci, Co): each tap is a lane-dense (Ci, Co) matmul operand.
    w_k = jnp.transpose(w_b, (0, 3, 4, 2, 1)).reshape(B, K * K, Ci, Co)
    w_k = w_k.astype(compute_dtype)

    P = (K - 1) // 2
    Wp = W + 2 * P

    # Row-tile size: target ~1024 flattened pixel rows per matmul tile.
    TH = max(K, min(max(H, K), max(1, 1024 // Wp)))
    n_tiles = -(-H // TH)
    M = TH * Wp
    halo_rows = min(M, _round_up(K * Wp, 8))

    # NCHW -> NHWC (channels on lanes), zero-pad spatially; the bottom padding
    # also rounds the height to (n_tiles + 1) * TH so the next-tile halo block
    # always exists.
    h_total = (n_tiles + 1) * TH
    x = jnp.transpose(fmap, (0, 2, 3, 1)).astype(compute_dtype)
    x = jnp.pad(x, ((0, 0), (P, h_total - H - P), (P, P), (0, 0)))
    x = x.reshape(B, n_tiles + 1, M, Ci)

    out = _mod_conv_pallas(x, w_k, n_tiles=n_tiles, K=K, Wp=Wp, halo_rows=halo_rows)

    # Flat padded-width result -> (B, H, W, Co) -> NCHW (one fused slice+transpose).
    y = out.reshape(B, n_tiles * TH, Wp, Co)[:, :H, :W, :]
    return jnp.transpose(y, (0, 3, 1, 2))


# ---------------------------------------------------------------------------
# Pure-XLA reference (mirrors the PyTorch forward exactly, in f32).
# ---------------------------------------------------------------------------
def _reference_forward(fmap, weights, mod, kernel_mod=None, *, demod=True, eps=1e-8):
    K = weights.shape[-1]
    P = (K - 1) // 2
    w = _modulate_weights(weights, mod, kernel_mod, demod=demod, eps=eps)

    def conv_one(x_b, w_b):
        return jax.lax.conv_general_dilated(
            x_b[None].astype(jnp.float32), w_b, window_strides=(1, 1),
            padding=((P, P), (P, P)),
            dimension_numbers=("NCHW", "OIHW", "NCHW"))[0]

    return jax.vmap(conv_one)(fmap, w)


if __name__ == "__main__":
    key = jax.random.PRNGKey(0)
    k_w, k_x, k_m, k_k = jax.random.split(key, 4)

    B, dim, dim_out, K, H, W = 2, 8, 16, 3, 16, 16
    num_conv_kernels = 4

    weights = jax.random.normal(
        k_w, (num_conv_kernels, dim_out, dim, K, K), jnp.float32
    ) * (2.0 / (dim * K * K)) ** 0.5                      # ~kaiming_normal scale
    fmap = jax.random.normal(k_x, (B, dim, H, W), jnp.float32)
    mod = jax.random.normal(k_m, (B, dim), jnp.float32)
    kernel_mod = jax.random.normal(k_k, (B, num_conv_kernels), jnp.float32)

    fwd = jax.jit(adaptive_conv2d_mod_forward)
    out = jax.block_until_ready(fwd(fmap, weights, mod, kernel_mod))

    ref = _reference_forward(fmap, weights, mod, kernel_mod)
    assert out.shape == (B, dim_out, H, W)
    max_err = float(jnp.max(jnp.abs(out - ref)))
    # bf16 matmul operands with f32 accumulation vs f32 reference.
    assert max_err < 5e-2, f"max abs err {max_err}"
    print("KERNEL_OK")
</pallas_src>

<mosaic_0001>
module attributes {stable_mosaic.version = 11 : i64} {
  func.func @_mod_conv_kernel(%arg0: i32, %arg1: i32, %arg2: memref<1x1x288x8xbf16, #tpu.memory_space<vmem>>, %arg3: memref<1x1x56x8xbf16, #tpu.memory_space<vmem>>, %arg4: memref<1x9x8x16xbf16, #tpu.memory_space<vmem>>, %arg5: memref<1x1x288x16xf32, #tpu.memory_space<vmem>>, %arg6: memref<344x8xbf16, #tpu.memory_space<vmem>>) attributes {dimension_semantics = [#tpu.dimension_semantics<parallel>, #tpu.dimension_semantics<parallel>], iteration_bounds = array<i64: 2, 1>, scalar_prefetch = 0 : i64, scratch_operands = 1 : i64, tpu.core_type = #tpu.core_type<tc>, window_params = [{transform_indices = @transform_0, window_bounds = array<i64: 1, 1, 288, 8>}, {transform_indices = @transform_1, window_bounds = array<i64: 1, 1, 56, 8>}, {transform_indices = @transform_2, window_bounds = array<i64: 1, 9, 8, 16>}, {transform_indices = @transform_3, window_bounds = array<i64: 1, 1, 288, 16>}]} {
    %c0 = arith.constant 0 : index
    %c0_0 = arith.constant 0 : index
    %c0_1 = arith.constant 0 : index
    %c0_2 = arith.constant 0 : index
    %0 = vector.load %arg2[%c0, %c0_0, %c0_1, %c0_2] : memref<1x1x288x8xbf16, #tpu.memory_space<vmem>>, vector<1x1x288x8xbf16>
    %1 = vector.shape_cast %0 : vector<1x1x288x8xbf16> to vector<288x8xbf16>
    %c0_3 = arith.constant 0 : index
    %c0_4 = arith.constant 0 : index
    %2 = vector.load %arg6[%c0_3, %c0_4] : memref<344x8xbf16, #tpu.memory_space<vmem>>, vector<288x8xbf16>
    tpu.vector_store %arg6[%c0_3, %c0_4], %1 {strides = array<i32>} : memref<344x8xbf16, #tpu.memory_space<vmem>>, vector<288x8xbf16>,
    %c0_5 = arith.constant 0 : index
    %c0_6 = arith.constant 0 : index
    %c0_7 = arith.constant 0 : index
    %c0_8 = arith.constant 0 : index
    %3 = vector.load %arg3[%c0_5, %c0_6, %c0_7, %c0_8] : memref<1x1x56x8xbf16, #tpu.memory_space<vmem>>, vector<1x1x56x8xbf16>
    %4 = vector.shape_cast %3 : vector<1x1x56x8xbf16> to vector<56x8xbf16>
    %c288 = arith.constant 288 : index
    %c0_9 = arith.constant 0 : index
    %5 = vector.load %arg6[%c288, %c0_9] : memref<344x8xbf16, #tpu.memory_space<vmem>>, vector<56x8xbf16>
    tpu.vector_store %arg6[%c288, %c0_9], %4 {strides = array<i32>} : memref<344x8xbf16, #tpu.memory_space<vmem>>, vector<56x8xbf16>,
    %cst = arith.constant 0.000000e+00 : f32
    %6 = vector.broadcast %cst : f32 to vector<288x16xf32>
    %c0_10 = arith.constant 0 : index
    %c0_11 = arith.constant 0 : index
    %7 = vector.load %arg6[%c0_10, %c0_11] : memref<344x8xbf16, #tpu.memory_space<vmem>>, vector<288x8xbf16>
    %c0_12 = arith.constant 0 : index
    %c0_13 = arith.constant 0 : index
    %c0_14 = arith.constant 0 : index
    %c0_15 = arith.constant 0 : index
    %8 = vector.load %arg4[%c0_12, %c0_13, %c0_14, %c0_15] : memref<1x9x8x16xbf16, #tpu.memory_space<vmem>>, vector<1x1x8x16xbf16>
    %9 = vector.shape_cast %8 : vector<1x1x8x16xbf16> to vector<8x16xbf16>
    %cst_16 = arith.constant dense<0.000000e+00> : vector<288x16xf32>
    %10 = tpu.matmul %7, %9, %cst_16 {dimension_numbers = #tpu.dot_dimension_numbers<[1], [0], [0], [1], [0, 0, 1, 1], [], []>} : vector<288x8xbf16>, vector<8x16xbf16>, vector<288x16xf32> -> vector<288x16xf32>
    %11 = arith.addf %6, %10 : vector<288x16xf32>
    %c1 = arith.constant 1 : index
    %c0_17 = arith.constant 0 : index
    %12 = vector.load %arg6[%c1, %c0_17] : memref<344x8xbf16, #tpu.memory_space<vmem>>, vector<288x8xbf16>
    %c0_18 = arith.constant 0 : index
    %c1_19 = arith.constant 1 : index
    %c0_20 = arith.constant 0 : index
    %c0_21 = arith.constant 0 : index
    %13 = vector.load %arg4[%c0_18, %c1_19, %c0_20, %c0_21] : memref<1x9x8x16xbf16, #tpu.memory_space<vmem>>, vector<1x1x8x16xbf16>
    %14 = vector.shape_cast %13 : vector<1x1x8x16xbf16> to vector<8x16xbf16>
    %cst_22 = arith.constant dense<0.000000e+00> : vector<288x16xf32>
    %15 = tpu.matmul %12, %14, %cst_22 {dimension_numbers = #tpu.dot_dimension_numbers<[1], [0], [0], [1], [0, 0, 1, 1], [], []>} : vector<288x8xbf16>, vector<8x16xbf16>, vector<288x16xf32> -> vector<288x16xf32>
    %16 = arith.addf %11, %15 : vector<288x16xf32>
    %c2 = arith.constant 2 : index
    %c0_23 = arith.constant 0 : index
    %17 = vector.load %arg6[%c2, %c0_23] : memref<344x8xbf16, #tpu.memory_space<vmem>>, vector<288x8xbf16>
    %c0_24 = arith.constant 0 : index
    %c2_25 = arith.constant 2 : index
    %c0_26 = arith.constant 0 : index
    %c0_27 = arith.constant 0 : index
    %18 = vector.load %arg4[%c0_24, %c2_25, %c0_26, %c0_27] : memref<1x9x8x16xbf16, #tpu.memory_space<vmem>>, vector<1x1x8x16xbf16>
    %19 = vector.shape_cast %18 : vector<1x1x8x16xbf16> to vector<8x16xbf16>
    %cst_28 = arith.constant dense<0.000000e+00> : vector<288x16xf32>
    %20 = tpu.matmul %17, %19, %cst_28 {dimension_numbers = #tpu.dot_dimension_numbers<[1], [0], [0], [1], [0, 0, 1, 1], [], []>} : vector<288x8xbf16>, vector<8x16xbf16>, vector<288x16xf32> -> vector<288x16xf32>
    %21 = arith.addf %16, %20 : vector<288x16xf32>
    %c18 = arith.constant 18 : index
    %c0_29 = arith.constant 0 : index
    %22 = vector.load %arg6[%c18, %c0_29] : memref<344x8xbf16, #tpu.memory_space<vmem>>, vector<288x8xbf16>
    %c0_30 = arith.constant 0 : index
    %c3 = arith.constant 3 : index
    %c0_31 = arith.constant 0 : index
    %c0_32 = arith.constant 0 : index
    %23 = vector.load %arg4[%c0_30, %c3, %c0_31, %c0_32] : memref<1x9x8x16xbf16, #tpu.memory_space<vmem>>, vector<1x1x8x16xbf16>
    %24 = vector.shape_cast %23 : vector<1x1x8x16xbf16> to vector<8x16xbf16>
    %cst_33 = arith.constant dense<0.000000e+00> : vector<288x16xf32>
    %25 = tpu.matmul %22, %24, %cst_33 {dimension_numbers = #tpu.dot_dimension_numbers<[1], [0], [0], [1], [0, 0, 1, 1], [], []>} : vector<288x8xbf16>, vector<8x16xbf16>, vector<288x16xf32> -> vector<288x16xf32>
    %26 = arith.addf %21, %25 : vector<288x16xf32>
    %c19 = arith.constant 19 : index
    %c0_34 = arith.constant 0 : index
    %27 = vector.load %arg6[%c19, %c0_34] : memref<344x8xbf16, #tpu.memory_space<vmem>>, vector<288x8xbf16>
    %c0_35 = arith.constant 0 : index
    %c4 = arith.constant 4 : index
    %c0_36 = arith.constant 0 : index
    %c0_37 = arith.constant 0 : index
    %28 = vector.load %arg4[%c0_35, %c4, %c0_36, %c0_37] : memref<1x9x8x16xbf16, #tpu.memory_space<vmem>>, vector<1x1x8x16xbf16>
    %29 = vector.shape_cast %28 : vector<1x1x8x16xbf16> to vector<8x16xbf16>
    %cst_38 = arith.constant dense<0.000000e+00> : vector<288x16xf32>
    %30 = tpu.matmul %27, %29, %cst_38 {dimension_numbers = #tpu.dot_dimension_numbers<[1], [0], [0], [1], [0, 0, 1, 1], [], []>} : vector<288x8xbf16>, vector<8x16xbf16>, vector<288x16xf32> -> vector<288x16xf32>
    %31 = arith.addf %26, %30 : vector<288x16xf32>
    %c20 = arith.constant 20 : index
    %c0_39 = arith.constant 0 : index
    %32 = vector.load %arg6[%c20, %c0_39] : memref<344x8xbf16, #tpu.memory_space<vmem>>, vector<288x8xbf16>
    %c0_40 = arith.constant 0 : index
    %c5 = arith.constant 5 : index
    %c0_41 = arith.constant 0 : index
    %c0_42 = arith.constant 0 : index
    %33 = vector.load %arg4[%c0_40, %c5, %c0_41, %c0_42] : memref<1x9x8x16xbf16, #tpu.memory_space<vmem>>, vector<1x1x8x16xbf16>
    %34 = vector.shape_cast %33 : vector<1x1x8x16xbf16> to vector<8x16xbf16>
    %cst_43 = arith.constant dense<0.000000e+00> : vector<288x16xf32>
    %35 = tpu.matmul %32, %34, %cst_43 {dimension_numbers = #tpu.dot_dimension_numbers<[1], [0], [0], [1], [0, 0, 1, 1], [], []>} : vector<288x8xbf16>, vector<8x16xbf16>, vector<288x16xf32> -> vector<288x16xf32>
    %36 = arith.addf %31, %35 : vector<288x16xf32>
    %c36 = arith.constant 36 : index
    %c0_44 = arith.constant 0 : index
    %37 = vector.load %arg6[%c36, %c0_44] : memref<344x8xbf16, #tpu.memory_space<vmem>>, vector<288x8xbf16>
    %c0_45 = arith.constant 0 : index
    %c6 = arith.constant 6 : index
    %c0_46 = arith.constant 0 : index
    %c0_47 = arith.constant 0 : index
    %38 = vector.load %arg4[%c0_45, %c6, %c0_46, %c0_47] : memref<1x9x8x16xbf16, #tpu.memory_space<vmem>>, vector<1x1x8x16xbf16>
    %39 = vector.shape_cast %38 : vector<1x1x8x16xbf16> to vector<8x16xbf16>
    %cst_48 = arith.constant dense<0.000000e+00> : vector<288x16xf32>
    %40 = tpu.matmul %37, %39, %cst_48 {dimension_numbers = #tpu.dot_dimension_numbers<[1], [0], [0], [1], [0, 0, 1, 1], [], []>} : vector<288x8xbf16>, vector<8x16xbf16>, vector<288x16xf32> -> vector<288x16xf32>
    %41 = arith.addf %36, %40 : vector<288x16xf32>
    %c37 = arith.constant 37 : index
    %c0_49 = arith.constant 0 : index
    %42 = vector.load %arg6[%c37, %c0_49] : memref<344x8xbf16, #tpu.memory_space<vmem>>, vector<288x8xbf16>
    %c0_50 = arith.constant 0 : index
    %c7 = arith.constant 7 : index
    %c0_51 = arith.constant 0 : index
    %c0_52 = arith.constant 0 : index
    %43 = vector.load %arg4[%c0_50, %c7, %c0_51, %c0_52] : memref<1x9x8x16xbf16, #tpu.memory_space<vmem>>, vector<1x1x8x16xbf16>
    %44 = vector.shape_cast %43 : vector<1x1x8x16xbf16> to vector<8x16xbf16>
    %cst_53 = arith.constant dense<0.000000e+00> : vector<288x16xf32>
    %45 = tpu.matmul %42, %44, %cst_53 {dimension_numbers = #tpu.dot_dimension_numbers<[1], [0], [0], [1], [0, 0, 1, 1], [], []>} : vector<288x8xbf16>, vector<8x16xbf16>, vector<288x16xf32> -> vector<288x16xf32>
    %46 = arith.addf %41, %45 : vector<288x16xf32>
    %c38 = arith.constant 38 : index
    %c0_54 = arith.constant 0 : index
    %47 = vector.load %arg6[%c38, %c0_54] : memref<344x8xbf16, #tpu.memory_space<vmem>>, vector<288x8xbf16>
    %c0_55 = arith.constant 0 : index
    %c8 = arith.constant 8 : index
    %c0_56 = arith.constant 0 : index
    %c0_57 = arith.constant 0 : index
    %48 = vector.load %arg4[%c0_55, %c8, %c0_56, %c0_57] : memref<1x9x8x16xbf16, #tpu.memory_space<vmem>>, vector<1x1x8x16xbf16>
    %49 = vector.shape_cast %48 : vector<1x1x8x16xbf16> to vector<8x16xbf16>
    %cst_58 = arith.constant dense<0.000000e+00> : vector<288x16xf32>
    %50 = tpu.matmul %47, %49, %cst_58 {dimension_numbers = #tpu.dot_dimension_numbers<[1], [0], [0], [1], [0, 0, 1, 1], [], []>} : vector<288x8xbf16>, vector<8x16xbf16>, vector<288x16xf32> -> vector<288x16xf32>
    %51 = arith.addf %46, %50 : vector<288x16xf32>
    %c0_59 = arith.constant 0 : index
    %c0_60 = arith.constant 0 : index
    %c0_61 = arith.constant 0 : index
    %c0_62 = arith.constant 0 : index
    %52 = vector.load %arg5[%c0_59, %c0_60, %c0_61, %c0_62] : memref<1x1x288x16xf32, #tpu.memory_space<vmem>>, vector<1x1x288x16xf32>
    %53 = vector.shape_cast %52 : vector<1x1x288x16xf32> to vector<288x16xf32>
    %54 = vector.shape_cast %51 : vector<288x16xf32> to vector<1x1x288x16xf32>
    tpu.vector_store %arg5[%c0_59, %c0_60, %c0_61, %c0_62], %54 {strides = array<i32>} : memref<1x1x288x16xf32, #tpu.memory_space<vmem>>, vector<1x1x288x16xf32>,
    return
  }
  func.func @transform_0(%arg0: i32, %arg1: i32) -> (i32, i32, i32, i32) {
    %c0_i32 = arith.constant 0 : i32
    %c0_i32_0 = arith.constant 0 : i32
    %c0_i32_1 = arith.constant 0 : i32
    return %arg0, %arg1, %c0_i32, %c0_i32_0 : i32, i32, i32, i32
  }
  func.func @transform_1(%arg0: i32, %arg1: i32) -> (i32, i32, i32, i32) {
    %c1_i32 = arith.constant 1 : i32
    %0 = arith.addi %arg1, %c1_i32 : i32
    %c0_i32 = arith.constant 0 : i32
    %c0_i32_0 = arith.constant 0 : i32
    %c0_i32_1 = arith.constant 0 : i32
    return %arg0, %0, %c0_i32, %c0_i32_0 : i32, i32, i32, i32
  }
  func.func @transform_2(%arg0: i32, %arg1: i32) -> (i32, i32, i32, i32) {
    %c0_i32 = arith.constant 0 : i32
    %c0_i32_0 = arith.constant 0 : i32
    %c0_i32_1 = arith.constant 0 : i32
    %c0_i32_2 = arith.constant 0 : i32
    return %arg0, %c0_i32, %c0_i32_0, %c0_i32_1 : i32, i32, i32, i32
  }
  func.func @transform_3(%arg0: i32, %arg1: i32) -> (i32, i32, i32, i32) {
    %c0_i32 = arith.constant 0 : i32
    %c0_i32_0 = arith.constant 0 : i32
    %c0_i32_1 = arith.constant 0 : i32
    return %arg0, %arg1, %c0_i32, %c0_i32_0 : i32, i32, i32, i32
  }
}

</mosaic_0001>

<bundles_post_ra>
// kernel: adaptive_conv2d_mod_forward.1
= control target key start
LH: loop header
LB: loop body
LE: loop exit
PB: predicated region body
PF: predicated region fallthrough
CT: control target
= control target key end

     0   :  { %s5166_s12 = smov 0   ;;  %s5168_s13 = smov 0   ;;  %s6085_s0 = inlined_call_operand.vmem [shape: bf16[2,2,288,8], index: 0, kind: input, shape index: {}, may-alias: {0,1}]   ;;  %s6086_s1 = inlined_call_operand.vmem [shape: bf16[2,2,288,8], index: 1, kind: input, shape index: {}, may-alias: {0,1}]   ;;  %s6087_s2 = inlined_call_operand.vmem [shape: bf16[2,9,8,16], index: 2, kind: input, shape index: {}]   ;;  %s6088_s3 = inlined_call_operand.vmem [shape: f32[2,1,288,16], index: 3, kind: output, shape index: {}]  }
   0x1   :  { %s5170_s14 = smov 0  }
   0x2 LB: > { %s25_s15 = sadd.s32 1, %s5140_s13  ;;  %p3970_p0 = scmp.ge.s32.totalorder %s5144_s14, 1  ;;  %s5144_s14 = sphi %s5170_s14, %s13_s14   ;;  %s5140_s13 = sphi %s5168_s13, %s6090_s13   ;;  %s5136_s12 = sphi %s5166_s12, %s6089_s12  }
   0x3   : > { %p27_p1 = scmp.ge.s32.totalorder %s25_s15, 2  ;;  %p187_p2 = scmp.lt.s32.totalorder %s5144_s14, 3 }
   0x5   : > { %s6092_s15 = smov (%p27_p1, %s25_s15), 0  ;;  %p188_p3 = pnand %p3970_p0, %p187_p2 }
   0x6   : > { %p234_p4 = scmp.lt.s32.totalorder (!%p188_p3), %s5136_s12, 1  ;;  %vm305_vm0 = vcmask (!%p188_p3), 60416   ;;  %vm693_vm1 = vcmask (!%p188_p3), 1043456   ;;  %vm489_vm2 = vsmask.f32 (!%p188_p3), 7424  ;;  %vm638_vm3 = vcmask (!%p188_p3), 64512  }
   0x7   : > { %191 = sbr.rel (%p188_p3) target bundleno = 583 (0x247), region = 32  ;;  %vm1849_vm4 = vsmask.f32 (!%p188_p3), 6400  ;;  %vm2296_vm5 = vcmask (!%p188_p3), 1045504   ;;  %vm1096_vm6 = vcmask (!%p188_p3), 1046528   ;;  %vm3496_vm8 = vcmask (!%p188_p3), 1044480  }
   0x8   : > { %vm3049_vm7 = vsmask.f32 (!%p188_p3), 5376  ;;  %vm3804_vm9 = vcmask (!%p188_p3), 130048  }
   0xe   : > { %s6094_s12 = smov (!%p234_p4, %s5136_s12), 1 }
   0xf   : > { %s5184_s16 = smul.u32 288, %s6094_s12 }
  0x10   : > { %s5026_s24 = smul.u32 36, %s6094_s12 }
  0x11   : > { %s5190_s19 = scalar_lea.vmem %s6085_s0, %s5184_s16  ;;  %s4210_s20 = sadd.s32 144, %s5184_s16 }
  0x12   : > { %s5196_s23 = scalar_lea.vmem %s6086_s1, %s4210_s20  ;;  %v269_v0 = vld [vmem:[%s5190_s19] sm:$0xf]  ;;  %v270_v1 = vld [vmem:[%s5190_s19 + $0x4] sm:$0xf]  ;;  %s5207_s27 = scalar_lea.vmem %s6087_s2, %s5026_s24  ;;  %v271_v4 = vld [vmem:[%s5190_s19 + $0x8] sm:$0xf] }
  0x13   : > { %v343_v2 = vld [vmem:[%s5196_s23 + $0x4] sm:$0xf]  ;;  %v345_v3 = vld [vmem:[%s5196_s23 + $0xc] sm:$0xf]  ;;  %306 = vst.msk [vmem:[#allocation2] sm:$0xf] %vm305_vm0, %v269_v0  ;;  %s6001_s30 = scalar_lea.vmem %s6088_s3, %s5184_s16 }
  0x14   : > { %307 = vst.msk [vmem:[#allocation2 + $0x4] sm:$0xf] %vm305_vm0, %v270_v1  ;;  %350 = vst.msk [vmem:[#allocation2 + $0x94] sm:$0xf] %vm305_vm0, %v343_v2  ;;  %v272_v5 = vld [vmem:[%s5190_s19 + $0xc] sm:$0xf] }
  0x15   : > { %352 = vst.msk [vmem:[#allocation2 + $0x9c] sm:$0xf] %vm305_vm0, %v345_v3  ;;  %v4089_v6 = vld [vmem:[%s5207_s27 + $0x10] sm:$0xf]  ;;  %v3975_v7 = vld [vmem:[%s5207_s27 + $0x4] sm:$0xf] }
  0x16   : > { %308 = vst.msk [vmem:[#allocation2 + $0x8] sm:$0xf] %vm305_vm0, %v271_v4  ;;  %309 = vst.msk [vmem:[#allocation2 + $0xc] sm:$0xf] %vm305_vm0, %v272_v5  ;;  %v273_v8 = vld [vmem:[%s5190_s19 + $0x10] sm:$0xf]  ;;  %5018 = vmatprep.subr.msk.bf16.mxu0 %vm693_vm1, %v4089_v6  ;;  %5014 = vmatprep.subr.msk.bf16.mxu1 %vm693_vm1, %v3975_v7 }
  0x17   : > { %v5221_v9 = vsel %vm693_vm1, %v4089_v6, 0  ;;  %v695_v10 = vsel %vm693_vm1, %v3975_v7, 0  ;;  %v274_v11 = vld [vmem:[%s5190_s19 + $0x14] sm:$0xf]  ;;  %310 = vst.msk [vmem:[#allocation2 + $0x10] sm:$0xf] %vm305_vm0, %v273_v8 }
  0x18   : > { %v4109_v12 = vld [vmem:[%s5207_s27 + $0x14] sm:$0xf]  ;;  %4535 = vmatpush3.bf16.msra.mxu0 %v5221_v9  ;;  %4383 = vmatpush3.bf16.msra.mxu1 %v695_v10  ;;  %311 = vst.msk [vmem:[#allocation2 + $0x14] sm:$0xf] %vm305_vm0, %v274_v11  ;;  %v275_v13 = vld [vmem:[%s5190_s19 + $0x18] sm:$0xf] }
  0x19   : > { %v276_v14 = vld [vmem:[%s5190_s19 + $0x1c] sm:$0xf]  ;;  %5020 = vmatprep.subr.msk.bf16.mxu0 %vm693_vm1, %v4109_v12  ;;  %312 = vst.msk [vmem:[#allocation2 + $0x18] sm:$0xf] %vm305_vm0, %v275_v13  ;;  %v392_v15 = vld [vmem:[%s5207_s27] sm:$0xf] }
  0x1a   : > { %313 = vst.msk [vmem:[#allocation2 + $0x1c] sm:$0xf] %vm305_vm0, %v276_v14  ;;  %v277_v16 = vld [vmem:[%s5190_s19 + $0x20] sm:$0xf]  ;;  %v278_v17 = vld [vmem:[%s5190_s19 + $0x24] sm:$0xf]  ;;  %5015 = vmatprep.subr.msk.bf16.mxu1 %vm693_vm1, %v392_v15 }
  0x1b   : > { %v5238_v18 = vsel %vm693_vm1, %v4109_v12, 0  ;;  %314 = vst.msk [vmem:[#allocation2 + $0x20] sm:$0xf] %vm305_vm0, %v277_v16  ;;  %315 = vst.msk [vmem:[#allocation2 + $0x24] sm:$0xf] %vm305_vm0, %v278_v17  ;;  %v911_v29 = vsel %vm693_vm1, %v392_v15, 0 }
  0x1c   : > { %v279_v19 = vld [vmem:[%s5190_s19 + $0x28] sm:$0xf]  ;;  %v280_v20 = vld [vmem:[%s5190_s19 + $0x2c] sm:$0xf]  ;;  %v356_v21 = vld [vmem:[#allocation2] sm:$0xf] }
  0x1d   : > { %v5245_v22 = vld [vmem:[#allocation2 + $0x4] sm:$0xf]  ;;  %316 = vst.msk [vmem:[#allocation2 + $0x28] sm:$0xf] %vm305_vm0, %v279_v19  ;;  %317 = vst.msk [vmem:[#allocation2 + $0x2c] sm:$0xf] %vm305_vm0, %v280_v20 }
  0x1e   : > { %v281_v23 = vld [vmem:[%s5190_s19 + $0x30] sm:$0xf]  ;;  %v5251_v24 = vcombine.low %v356_v21, %v5245_v22  ;;  %v282_v25 = vld [vmem:[%s5190_s19 + $0x34] sm:$0xf]  ;;  %v283_v26 = vld [vmem:[%s5190_s19 + $0x38] sm:$0xf] }
  0x1f   : > { %318 = vst.msk [vmem:[#allocation2 + $0x30] sm:$0xf] %vm305_vm0, %v281_v23  ;;  %v284_v27 = vld [vmem:[%s5190_s19 + $0x3c] sm:$0xf]  ;;  %v5257_v28 = vld [vmem:[#allocation2 + $0x8] sm:$0xff]   ;;  %v5272_v38 = vld [vmem:[#allocation2 + $0x10] sm:$0xff]  }
  0x20   : > { %319 = vst.msk [vmem:[#allocation2 + $0x34] sm:$0xf] %vm305_vm0, %v282_v25  ;;  %320 = vst.msk [vmem:[#allocation2 + $0x38] sm:$0xf] %vm305_vm0, %v283_v26  ;;  %v491_v30 = vshrl.u32 %v5251_v24, 16  ;;  %v493_v31 = vshll.u32 %v5251_v24, 16 }
  0x21   : > { %321 = vst.msk [vmem:[#allocation2 + $0x3c] sm:$0xf] %vm305_vm0, %v284_v27  ;;  %v1404_v32 = vld [vmem:[#allocation2 + $0x8] sm:$0xe]  ;;  %v5265_v33 = vld [vmem:[#allocation2 + $0xc] sm:$0xf] }
  0x22   : > { %v498_v34 = vshll.u32 %v5257_v28, 16  ;;  %v502_v35 = vshrl.u32 %v5257_v28, 16  ;;  %v5270_v36 = vcombine.low %v1404_v32, %v5265_v33  ;;  %v495_v37 = vrot.slane %v493_v31, 1  ;;  %v5276_v42 = vld [vmem:[#allocation2 + $0x10] sm:$0xff]   ;;  %v5280_v46 = vld [vmem:[#allocation2 + $0x18] sm:$0xff]   ;;  %v5285_v52 = vld [vmem:[#allocation2 + $0x20] sm:$0xff]  }
  0x23   : > { %v1859_v44 = vshrl.u32 %v5272_v38, 16  ;;  %v1862_v45 = vshll.u32 %v5272_v38, 16  ;;  %v5282_v47 = vld [vmem:[#allocation2 + $0x18] sm:$0xff]   ;;  %v506_v51 = vshll.u32 %v5276_v42, 16  ;;  %v1868_v56 = vshrl.u32 %v5280_v46, 16  ;;  %v5289_v57 = vld [vmem:[#allocation2 + $0x20] sm:$0xff]  }
  0x24   : > { %v500_v39 = vrot.slane %v498_v34, 1  ;;  %v1851_v40 = vshrl.u32 %v5270_v36, 16  ;;  %v1854_v41 = vshll.u32 %v5270_v36, 16  ;;  %v496_v43 = vor.u32 %v495_v37, %v491_v30  ;;  %v5294_v62 = vld [vmem:[#allocation2 + $0x28] sm:$0xff]  }
  0x25   : > { %v1861_v54 = vrot.slane %v1859_v44, 1  ;;  %v1864_v55 = vrot.slane %v1862_v45, 2  ;;  %v508_v59 = vrot.slane %v506_v51, 1  ;;  %v1871_v60 = vshll.u32 %v5280_v46, 16  ;;  %v5298_v3 = vld [vmem:[#allocation2 + $0x28] sm:$0xff]  }
  0x26   : > { %v504_v48 = vor.u32 %v502_v35, %v500_v39  ;;  %v1853_v49 = vrot.slane %v1851_v40, 1  ;;  %v1856_v50 = vrot.slane %v1854_v41, 2  ;;  %v501_v53 = vsel %vm489_vm2, %v496_v43, %v500_v39 }
  0x27   : > { %4384 = vmatprep.mubr.msk.bf16.mxu1 %vm638_vm3, %v501_v53  ;;  %v510_v61 = vshrl.u32 %v5276_v42, 16  ;;  %v1865_v63 = vor.u32 %v1864_v55, %v1861_v54  ;;  %v1870_v0 = vrot.slane %v1868_v56, 1  ;;  %v514_v1 = vshll.u32 %v5282_v47, 16  ;;  %v5305_v13 = vld [vmem:[#allocation2 + $0x30] sm:$0xff]  }
  0x28   : > { %v1857_v58 = vor.u32 %v1856_v50, %v1853_v49  ;;  %v1877_v2 = vshrl.u32 %v5285_v52, 16  ;;  %v509_v4 = vsel %vm489_vm2, %v504_v48, %v508_v59  ;;  %v1873_v5 = vrot.slane %v1871_v60, 2  ;;  %v5310_v19 = vld [vmem:[#allocation2 + $0x30] sm:$0xff]   ;;  %v5325_v43 = vld [vmem:[#allocation2 + $0x38] sm:$0xff]   ;;  %v285_v60 = vld [vmem:[%s5190_s19 + $0x40] sm:$0xf] }
  0x29   : > { %v512_v6 = vor.u32 %v510_v61, %v508_v59  ;;  %v1880_v7 = vshll.u32 %v5285_v52, 16  ;;  %4385 = vmatmul.mubr.msk.bf16.vlgmr.msra.gmra.mrb[0].mxu1 %vm638_vm3, %v509_v4  ;;  %v516_v10 = vrot.slane %v514_v1, 1  ;;  %v518_v12 = vshrl.u32 %v5282_v47, 16  ;;  %v5328_v50 = vld [vmem:[#allocation2 + $0x38] sm:$0xff]   ;;  %v286_v61 = vld [vmem:[%s5190_s19 + $0x44] sm:$0xf] }
  0x2a   : > { %v1866_v8 = vsel %vm1849_vm4, %v1857_v58, %v1865_v63  ;;  %v1879_v11 = vrot.slane %v1877_v2, 1  ;;  %v1874_v14 = vor.u32 %v1873_v5, %v1870_v0  ;;  %v522_v16 = vshll.u32 %v5289_v57, 16  ;;  %4421 = vmatpush3.bf16.msra.mxu1 %v911_v29  ;;  %322 = vst.msk [vmem:[#allocation2 + $0x40] sm:$0xf] %vm305_vm0, %v285_v60  ;;  %323 = vst.msk [vmem:[#allocation2 + $0x44] sm:$0xf] %vm305_vm0, %v286_v61 }
  0x2b   : > { %4536 = vmatprep.mubr.msk.bf16.mxu0 %vm638_vm3, %v1866_v8  ;;  %v1882_v15 = vrot.slane %v1880_v7, 2  ;;  %v1886_v17 = vshrl.u32 %v5294_v62, 16  ;;  %v517_v20 = vsel %vm489_vm2, %v512_v6, %v516_v10  ;;  %v520_v21 = vor.u32 %v518_v12, %v516_v10  ;;  %v287_v4 = vld [vmem:[%s5190_s19 + $0x48] sm:$0xf]  ;;  %v288_v6 = vld [vmem:[%s5190_s19 + $0x4c] sm:$0xf] }
  0x2c   : > { %v1889_v23 = vshll.u32 %v5294_v62, 16  ;;  %v526_v25 = vshrl.u32 %v5289_v57, 16  ;;  %v1875_v26 = vsel %vm1849_vm4, %v1865_v63, %v1874_v14  ;;  %4388 = vmatprep.mubr.msk.bf16.mxu1 %vm638_vm3, %v517_v20  ;;  %v524_v30 = vrot.slane %v522_v16, 1  ;;  %324 = vst.msk [vmem:[#allocation2 + $0x48] sm:$0xf] %vm305_vm0, %v287_v4 }
  0x2d   : > { %v1883_v27 = vor.u32 %v1882_v15, %v1879_v11  ;;  %v1888_v31 = vrot.slane %v1886_v17, 1  ;;  %4537 = vmatmul.mubr.msk.bf16.vlgmr.msra.gmra.mrb[0].mxu0 %vm638_vm3, %v1875_v26  ;;  %v530_v32 = vshll.u32 %v5298_v3, 16  ;;  %v1895_v34 = vshrl.u32 %v5305_v13, 16  ;;  %v289_v7 = vld [vmem:[%s5190_s19 + $0x50] sm:$0xf] }
  0x2e   : > { %v1891_v29 = vrot.slane %v1889_v23, 2  ;;  %v1898_v35 = vshll.u32 %v5305_v13, 16  ;;  %4573 = vmatpush3.bf16.msra.mxu0 %v5238_v18  ;;  %v525_v39 = vsel %vm489_vm2, %v520_v21, %v524_v30  ;;  %v528_v40 = vor.u32 %v526_v25, %v524_v30  ;;  %325 = vst.msk [vmem:[#allocation2 + $0x4c] sm:$0xf] %vm305_vm0, %v288_v6  ;;  %v290_v11 = vld [vmem:[%s5190_s19 + $0x54] sm:$0xf] }
  0x2f   : > { %v1884_v37 = vsel %vm1849_vm4, %v1874_v14, %v1883_v27  ;;  %v534_v41 = vshrl.u32 %v5298_v3, 16  ;;  %v532_v45 = vrot.slane %v530_v32, 1  ;;  %v1897_v48 = vrot.slane %v1895_v34, 1  ;;  %326 = vst.msk [vmem:[#allocation2 + $0x50] sm:$0xf] %vm305_vm0, %v289_v7 }
  0x30   : > { %4540 = vmatprep.mubr.msk.bf16.mxu0 %vm638_vm3, %v1884_v37  ;;  %v1892_v44 = vor.u32 %v1891_v29, %v1888_v31  ;;  %v1900_v49 = vrot.slane %v1898_v35, 2  ;;  %v538_v18 = vshll.u32 %v5310_v19, 16  ;;  %v1904_v51 = vshrl.u32 %v5325_v43, 16  ;;  %v291_v12 = vld [vmem:[%s5190_s19 + $0x58] sm:$0xf] }
  0x31   : > { %v1907_v53 = vshll.u32 %v5325_v43, 16  ;;  %v542_v54 = vshrl.u32 %v5310_v19, 16  ;;  %4389 = vmatmul.mubr.msk.bf16.gmra.mrb[4].mxu1 %vm638_vm3, %v525_v39  ;;  %v533_v56 = vsel %vm489_vm2, %v528_v40, %v532_v45  ;;  %v536_v59 = vor.u32 %v534_v41, %v532_v45  ;;  %327 = vst.msk [vmem:[#allocation2 + $0x54] sm:$0xf] %vm305_vm0, %v290_v11  ;;  %v292_v14 = vld [vmem:[%s5190_s19 + $0x5c] sm:$0xf] }
  0x32   : > { %v1893_v55 = vsel %vm1849_vm4, %v1883_v27, %v1892_v44  ;;  %v1901_v58 = vor.u32 %v1900_v49, %v1897_v48  ;;  %4392 = vmatprep.mubr.msk.bf16.mxu1 %vm638_vm3, %v533_v56  ;;  %v540_v63 = vrot.slane %v538_v18, 1  ;;  %v1906_v0 = vrot.slane %v1904_v51, 1  ;;  %328 = vst.msk [vmem:[#allocation2 + $0x58] sm:$0xf] %vm305_vm0, %v291_v12  ;;  %v2290_v15 = vld [vmem:[#allocation2 + $0x8] sm:$0xc] }
  0x33   : > { %v1909_v1 = vrot.slane %v1907_v53, 2  ;;  %v546_v2 = vshll.u32 %v5328_v50, 16  ;;  %v5357_v16 = vld [vmem:[%s5207_s27 + $0x18] sm:$0xf]  ;;  %329 = vst.msk [vmem:[#allocation2 + $0x5c] sm:$0xf] %vm305_vm0, %v292_v14  ;;  %v4110_v21 = vcombine.low %v2290_v15, %v5265_v33 }
  0x34   : > { %v1902_v5 = vsel %vm1849_vm4, %v1892_v44, %v1901_v58  ;;  %v544_v8 = vor.u32 %v542_v54, %v540_v63  ;;  %v541_v17 = vsel %vm489_vm2, %v536_v59, %v540_v63  ;;  %v293_v23 = vld [vmem:[%s5190_s19 + $0x60] sm:$0xf]  ;;  %v294_v25 = vld [vmem:[%s5190_s19 + $0x64] sm:$0xf]  ;;  %v295_v26 = vld [vmem:[%s5190_s19 + $0x68] sm:$0xf]  ;;  %5021 = vmatprep.subr.msk.bf16.mxu0 %vm693_vm1, %v5357_v16 }
  0x35   : > { %v548_v10 = vrot.slane %v546_v2, 1  ;;  %4541 = vmatmul.mubr.msk.bf16.gmra.mrb[4].mxu0 %vm638_vm3, %v1893_v55  ;;  %v1910_v20 = vor.u32 %v1909_v1, %v1906_v0  ;;  %330 = vst.msk [vmem:[#allocation2 + $0x60] sm:$0xf] %vm305_vm0, %v293_v23  ;;  %331 = vst.msk [vmem:[#allocation2 + $0x64] sm:$0xf] %vm305_vm0, %v294_v25  ;;  %v550_v31 = vshrl.u32 %v5328_v50, 16 }
  0x36   : > { %4544 = vmatprep.mubr.msk.bf16.mxu0 %vm638_vm3, %v1902_v5  ;;  %v296_v30 = vld [vmem:[%s5190_s19 + $0x6c] sm:$0xf]  ;;  %332 = vst.msk [vmem:[#allocation2 + $0x68] sm:$0xf] %vm305_vm0, %v295_v26  ;;  %v297_v33 = vld [vmem:[%s5190_s19 + $0x70] sm:$0xf] }
  0x37   : > { %v549_v27 = vsel %vm489_vm2, %v544_v8, %v548_v10  ;;  %333 = vst.msk [vmem:[#allocation2 + $0x6c] sm:$0xf] %vm305_vm0, %v296_v30  ;;  %v298_v29 = vld [vmem:[%s5190_s19 + $0x74] sm:$0xf]  ;;  %v5378_v32 = vld [vmem:[#allocation2 + $0x40] sm:$0xff]   ;;  %v2298_v34 = vrot.slane %v5272_v38, 2  ;;  %v1911_v35 = vsel %vm1849_vm4, %v1901_v58, %v1910_v20  ;;  %v552_v44 = vor.u32 %v550_v31, %v548_v10 }
  0x38   : > { %334 = vst.msk [vmem:[#allocation2 + $0x70] sm:$0xf] %vm305_vm0, %v297_v33  ;;  %335 = vst.msk [vmem:[#allocation2 + $0x74] sm:$0xf] %vm305_vm0, %v298_v29  ;;  %v5385_v37 = vld [vmem:[#allocation2 + $0x40] sm:$0xff]   ;;  %v5387_v39 = vrot.slane %v4110_v21, 2 }
  0x39   : > { %4393 = vmatmul.mubr.msk.bf16.gmra.mrb[8].mxu1 %vm638_vm3, %v541_v17  ;;  %v1913_v40 = vshrl.u32 %v5378_v32, 16  ;;  %v1916_v41 = vshll.u32 %v5378_v32, 16  ;;  %v554_v45 = vshll.u32 %v5385_v37, 16  ;;  %v5392_v48 = vld [vmem:[#allocation2 + $0x48] sm:$0xff]   ;;  %v558_v53 = vshrl.u32 %v5385_v37, 16  ;;  %v5400_v58 = vld [vmem:[#allocation2 + $0x50] sm:$0xff]  }
  0x3a   : > { %4396 = vmatprep.mubr.msk.bf16.mxu1 %vm638_vm3, %v549_v27  ;;  %v5395_v51 = vld [vmem:[#allocation2 + $0x48] sm:$0xff]   ;;  %v1922_v55 = vshrl.u32 %v5392_v48, 16  ;;  %v1925_v56 = vshll.u32 %v5392_v48, 16  ;;  %v5403_v61 = vld [vmem:[#allocation2 + $0x50] sm:$0xff]   ;;  %v1931_v6 = vshrl.u32 %v5400_v58, 16  ;;  %v1934_v7 = vshll.u32 %v5400_v58, 16 }
  0x3b   : > { %v1915_v49 = vrot.slane %v1913_v40, 1  ;;  %v1918_v18 = vrot.slane %v1916_v41, 2  ;;  %v556_v54 = vrot.slane %v554_v45, 1  ;;  %v562_v60 = vshll.u32 %v5395_v51, 16  ;;  %v5410_v8 = vld [vmem:[#allocation2 + $0x58] sm:$0xff]  }
  0x3c   : > { %v1924_v0 = vrot.slane %v1922_v55, 1  ;;  %v1927_v1 = vrot.slane %v1925_v56, 2  ;;  %v566_v11 = vshrl.u32 %v5395_v51, 16  ;;  %v570_v12 = vshll.u32 %v5403_v61, 16  ;;  %v5415_v14 = vld [vmem:[#allocation2 + $0x58] sm:$0xff]   ;;  %v5420_v25 = vld [vmem:[#allocation2 + $0x60] sm:$0xff]  }
  0x3d   : > { %4545 = vmatmul.mubr.msk.bf16.gmra.mrb[8].mxu0 %vm638_vm3, %v1911_v35  ;;  %v1919_v59 = vor.u32 %v1918_v18, %v1915_v49  ;;  %v557_v63 = vsel %vm489_vm2, %v552_v44, %v556_v54  ;;  %v560_v2 = vor.u32 %v558_v53, %v556_v54  ;;  %v564_v5 = vrot.slane %v562_v60, 1 }
  0x3e   : > { %v1928_v10 = vor.u32 %v1927_v1, %v1924_v0  ;;  %v574_v15 = vshrl.u32 %v5403_v61, 16  ;;  %v1936_v21 = vrot.slane %v1934_v7, 2  ;;  %v1940_v23 = vshrl.u32 %v5410_v8, 16  ;;  %v5428_v41 = vld [vmem:[#allocation2 + $0x68] sm:$0xff]   ;;  %v301_v0 = vld [vmem:[%s5190_s19 + $0x80] sm:$0xf] }
  0x3f   : > { %v1920_v4 = vsel %vm1849_vm4, %v1910_v20, %v1919_v59  ;;  %v565_v17 = vsel %vm489_vm2, %v560_v2, %v564_v5  ;;  %v1933_v20 = vrot.slane %v1931_v6, 1  ;;  %v568_v27 = vor.u32 %v566_v11, %v564_v5  ;;  %v302_v5 = vld [vmem:[%s5190_s19 + $0x84] sm:$0xf]  ;;  %338 = vst.msk [vmem:[#allocation2 + $0x80] sm:$0xf] %vm305_vm0, %v301_v0 }
  0x40   : > { %4548 = vmatprep.mubr.msk.bf16.mxu0 %vm638_vm3, %v1920_v4  ;;  %v1929_v26 = vsel %vm1849_vm4, %v1919_v59, %v1928_v10  ;;  %v572_v30 = vrot.slane %v570_v12, 1  ;;  %v1943_v31 = vshll.u32 %v5410_v8, 16  ;;  %v1942_v29 = vrot.slane %v1940_v23, 1  ;;  %v299_v59 = vld [vmem:[%s5190_s19 + $0x78] sm:$0xf]  ;;  %v5444_v4 = vld [vmem:[#allocation2 + $0x70] sm:$0xff]  }
  0x41   : > { %4397 = vmatmul.mubr.msk.bf16.gmra.mrb[12].mxu1 %vm638_vm3, %v557_v63  ;;  %v1937_v33 = vor.u32 %v1936_v21, %v1933_v20  ;;  %v578_v35 = vshll.u32 %v5415_v14, 16  ;;  %v582_v40 = vshrl.u32 %v5415_v14, 16  ;;  %v586_v18 = vshll.u32 %v5420_v25, 16  ;;  %v300_v63 = vld [vmem:[%s5190_s19 + $0x7c] sm:$0xf] }
  0x42   : > { %4400 = vmatprep.mubr.msk.bf16.mxu1 %vm638_vm3, %v565_v17  ;;  %v573_v44 = vsel %vm489_vm2, %v568_v27, %v572_v30  ;;  %v1945_v45 = vrot.slane %v1943_v31, 2  ;;  %v576_v49 = vor.u32 %v574_v15, %v572_v30  ;;  %v590_v55 = vshrl.u32 %v5420_v25, 16  ;;  %336 = vst.msk [vmem:[#allocation2 + $0x78] sm:$0xf] %vm305_vm0, %v299_v59  ;;  %337 = vst.msk [vmem:[#allocation2 + $0x7c] sm:$0xf] %vm305_vm0, %v300_v63 }
  0x43   : > { %v1938_v53 = vsel %vm1849_vm4, %v1928_v10, %v1937_v33  ;;  %v580_v54 = vrot.slane %v578_v35, 1  ;;  %v594_v56 = vshll.u32 %v5428_v41, 16  ;;  %v588_v2 = vrot.slane %v586_v18, 1  ;;  %v303_v6 = vld [vmem:[%s5190_s19 + $0x88] sm:$0xf] }
  0x44   : > { %v5437_v60 = vor.u32 %v1945_v45, %v1942_v29  ;;  %339 = vst.msk [vmem:[#allocation2 + $0x84] sm:$0xf] %vm305_vm0, %v302_v5  ;;  %v304_v11 = vld [vmem:[%s5190_s19 + $0x8c] sm:$0xf]  ;;  %340 = vst.msk [vmem:[#allocation2 + $0x88] sm:$0xf] %vm305_vm0, %v303_v6  ;;  %v2299_v15 = vsel %vm2296_vm5, %v5387_v39, %v2298_v34 }
  0x45   : > { %4549 = vmatmul.mubr.msk.bf16.gmra.mrb[12].mxu0 %vm638_vm3, %v1929_v26  ;;  %v581_v1 = vsel %vm489_vm2, %v576_v49, %v580_v54  ;;  %v584_v10 = vor.u32 %v582_v40, %v580_v54  ;;  %v342_v12 = vld [vmem:[%s5196_s23] sm:$0xf]  ;;  %v592_v17 = vor.u32 %v590_v55, %v588_v2  ;;  %v596_v20 = vrot.slane %v594_v56, 1  ;;  %341 = vst.msk [vmem:[#allocation2 + $0x8c] sm:$0xf] %vm305_vm0, %v304_v11 }
  0x46   : > { %4552 = vmatprep.mubr.msk.bf16.mxu0 %vm638_vm3, %v1938_v53  ;;  %v1947_v7 = vsel %vm1849_vm4, %v1937_v33, %v5437_v60  ;;  %349 = vst.msk [vmem:[#allocation2 + $0x90] sm:$0xf] %vm305_vm0, %v342_v12  ;;  %v5464_v21 = vld [vmem:[%s5207_s27 + $0x8] sm:$0xf]  ;;  %v602_v23 = vshll.u32 %v5444_v4, 16  ;;  %v2300_v39 = vrot.slane %v5280_v46, 2 }
  0x47   : > { %5016 = vmatprep.subr.msk.bf16.mxu1 %vm693_vm1, %v5464_v21  ;;  %v589_v26 = vsel %vm489_vm2, %v584_v10, %v588_v2  ;;  %v598_v27 = vshrl.u32 %v5428_v41, 16  ;;  %v597_v30 = vsel %vm489_vm2, %v592_v17, %v596_v20  ;;  %v2302_v31 = vrot.slane %v5285_v52, 2  ;;  %v344_v0 = vld [vmem:[%s5196_s23 + $0x8] sm:$0xf]  ;;  %v5511_v11 = vld [vmem:[%s5207_s27 + $0x1c] sm:$0xf] }
  0x48   : > { %v606_v33 = vshrl.u32 %v5444_v4, 16  ;;  %v604_v35 = vrot.slane %v602_v23, 1  ;;  %v2828_v52 = vsel %vm693_vm1, %v5357_v16, 0  ;;  %v2304_v54 = vrot.slane %v5294_v62, 2  ;;  %351 = vst.msk [vmem:[#allocation2 + $0x98] sm:$0xf] %vm305_vm0, %v344_v0 }
  0x49   : > { %4401 = vmatmul.mubr.msk.bf16.gmra.mrb[16].mxu1 %vm638_vm3, %v573_v44  ;;  %v5477_v29 = vld [vmem:[#allocation2 + $0x78] sm:$0xff]   ;;  %v2301_v44 = vsel %vm2296_vm5, %v2298_v34, %v2300_v39  ;;  %v600_v46 = vor.u32 %v598_v27, %v596_v20  ;;  %v2303_v18 = vsel %vm2296_vm5, %v2300_v39, %v2302_v31  ;;  %v2306_v38 = vrot.slane %v5305_v13, 2 }
  0x4a   : > { %4404 = vmatprep.mubr.msk.bf16.mxu1 %vm638_vm3, %v581_v1  ;;  %v610_v45 = vshll.u32 %v5477_v29, 16  ;;  %v608_v53 = vor.u32 %v606_v33, %v604_v35  ;;  %v614_v16 = vshrl.u32 %v5477_v29, 16  ;;  %v2305_v2 = vsel %vm2296_vm5, %v2302_v31, %v2304_v54 }
  0x4b   : > { %v5480_v40 = vld [vmem:[#allocation2 + $0x80] sm:$0xff]   ;;  %v605_v56 = vsel %vm489_vm2, %v600_v46, %v604_v35  ;;  %v2308_v12 = vrot.slane %v5325_v43, 2  ;;  %v2312_v31 = vrot.slane %v5392_v48, 2  ;;  %v2314_v33 = vrot.slane %v5400_v58, 2  ;;  %v346_v48 = vld [vmem:[%s5196_s23 + $0x10] sm:$0xf] }
  0x4c   : > { %v5487_v49 = vld [vmem:[#allocation2 + $0x88] sm:$0xff]   ;;  %v612_v55 = vrot.slane %v610_v45, 1  ;;  %v618_v34 = vshll.u32 %v5480_v40, 16  ;;  %v622_v59 = vshrl.u32 %v5480_v40, 16  ;;  %v5537_v46 = vld [vmem:[#allocation2 + $0x60] sm:$0xff]   ;;  %v2316_v45 = vrot.slane %v5410_v8, 2 }
  0x4d   : > { %4553 = vmatmul.mubr.msk.bf16.gmra.mrb[16].mxu0 %vm638_vm3, %v1947_v7  ;;  %v626_v63 = vshll.u32 %v5487_v49, 16  ;;  %v5504_v1 = vld [vmem:[#allocation2 + $0x90] ss:$0 sps:$4 sm:$0x11]   ;;  %v2307_v7 = vsel %vm2296_vm5, %v2304_v54, %v2306_v38  ;;  %v630_v20 = vshrl.u32 %v5487_v49, 16  ;;  %v2309_v39 = vsel %vm2296_vm5, %v2306_v38, %v2308_v12  ;;  %v5555_v8 = vld [vmem:[#allocation2 + $0x68] sm:$0xff]  }
  0x4e   : > { %4574 = vmatprep.mubr.msk.bf16.mxu0 %vm638_vm3, %v2299_v15  ;;  %v613_v62 = vsel %vm489_vm2, %v608_v53, %v612_v55  ;;  %v620_v13 = vrot.slane %v618_v34, 1  ;;  %v616_v5 = vor.u32 %v614_v16, %v612_v55  ;;  %v2310_v15 = vrot.slane %v5378_v32, 2  ;;  %353 = vst.msk [vmem:[#allocation2 + $0xa0] sm:$0xf] %vm305_vm0, %v346_v48  ;;  %v5558_v54 = vld [vmem:[#allocation2 + $0x70] sm:$0xff]   ;;  %v5571_v34 = vld [vmem:[#allocation2 + $0x78] sm:$0xff]  }
  0x4f   : > { %v628_v6 = vrot.slane %v626_v63, 1  ;;  %v634_v23 = vshll.u32 %v5504_v1, 16  ;;  %v2318_v58 = vrot.slane %v5537_v46, 2  ;;  %v2322_v55 = vrot.slane %v5558_v54, 2  ;;  %v5574_v16 = vld [vmem:[#allocation2 + $0x80] sm:$0xff]   ;;  %v5585_v0 = vld [vmem:[#allocation2 + $0x88] sm:$0xff]  }
  0x50   : > { %v624_v10 = vor.u32 %v622_v59, %v620_v13  ;;  %v621_v17 = vsel %vm489_vm2, %v616_v5, %v620_v13  ;;  %v2311_v32 = vsel %vm2296_vm5, %v2308_v12, %v2310_v15  ;;  %v2313_v35 = vsel %vm2296_vm5, %v2310_v15, %v2312_v31  ;;  %v5601_v15 = vld [vmem:[#allocation2 + $0x98] ss:$0 sps:$4 sm:$0x33]  }
  0x51   : > { %4405 = vmatmul.mubr.msk.bf16.gmra.mrb[20].mxu1 %vm638_vm3, %v589_v26  ;;  %v632_v27 = vor.u32 %v630_v20, %v628_v6  ;;  %v636_v43 = vrot.slane %v634_v23, 1  ;;  %v2319_v53 = vsel %vm2296_vm5, %v2316_v45, %v2318_v58  ;;  %v2324_v59 = vrot.slane %v5571_v34, 2  ;;  %v5607_v23 = vld [vmem:[#allocation2 + $0x18] sm:$0xff]  }
  0x52   : > { %4408 = vmatprep.mubr.msk.bf16.mxu1 %vm638_vm3, %v597_v30  ;;  %v629_v26 = vsel %vm489_vm2, %v624_v10, %v628_v6  ;;  %v2326_v63 = vrot.slane %v5574_v16, 2  ;;  %v2328_v5 = vrot.slane %v5585_v0, 2  ;;  %v5594_v10 = vld [vmem:[#allocation2 + $0x14] sm:$0xf]  ;;  %v3275_v48 = vsel %vm693_vm1, %v5511_v11, 0 }
  0x53   : > { %v637_v30 = vsel %vm489_vm2, %v632_v27, %v636_v43  ;;  %v2737_v27 = vrot.slane %v5607_v23, 2 }
  0x54   : > { %v2327_v13 = vsel %vm2296_vm5, %v2324_v59, %v2326_v63  ;;  %v2329_v12 = vsel %vm2296_vm5, %v2326_v63, %v2328_v5 }
  0x55   : > { %4575 = vmatmul.mubr.msk.bf16.vlgmr.msra.gmra.mrb[0].mxu0 %vm638_vm3, %v2301_v44  ;;  %v2315_v44 = vsel %vm2296_vm5, %v2312_v31, %v2314_v33  ;;  %v5622_v31 = vld [vmem:[#allocation2 + $0x28] sm:$0xff]  }
  0x56   : > { %4611 = vmatpush3.bf16.msra.mxu0 %v2828_v52  ;;  %4578 = vmatprep.mubr.msk.bf16.mxu0 %vm638_vm3, %v2303_v18  ;;  %v1189_v52 = vsel %vm693_vm1, %v5464_v21, 0  ;;  %v5548_v18 = vld [vmem:[%s5207_s27 + $0xc] sm:$0xf]  ;;  %v2320_v21 = vrot.slane %v5555_v8, 2 }
  0x57   : > { %5022 = vmatprep.subr.msk.bf16.mxu0 %vm693_vm1, %v5511_v11 }
  0x58   : > { %v2321_v38 = vsel %vm2296_vm5, %v2318_v58, %v2320_v21 }
  0x59   : > { %4409 = vmatmul.mubr.msk.bf16.gmra.mrb[24].mxu1 %vm638_vm3, %v605_v56  ;;  %v2323_v56 = vsel %vm2296_vm5, %v2320_v21, %v2322_v55 }
  0x5a   : > { %4412 = vmatprep.mubr.msk.bf16.mxu1 %vm638_vm3, %v613_v62  ;;  %v2325_v62 = vsel %vm2296_vm5, %v2322_v55, %v2324_v59  ;;  %v5654_v55 = vld [vmem:[#allocation2 + $0x40] sm:$0xff]  }
  0x5b   : > { %v1090_v59 = vld [vmem:[#allocation2] sm:$0xe]  ;;  %v2747_v63 = vrot.slane %v5654_v55, 2 }
  0x5d   : > { %4579 = vmatmul.mubr.msk.bf16.gmra.mrb[4].mxu0 %vm638_vm3, %v2305_v2  ;;  %v5588_v2 = vld [vmem:[#allocation2 + $0x90] sm:$0xff]  }
  0x5e   : > { %4582 = vmatprep.mubr.msk.bf16.mxu0 %vm638_vm3, %v2307_v7  ;;  %v2330_v6 = vrot.slane %v5588_v2, 2  ;;  %v2604_v7 = vld [vmem:[#allocation2 + $0x10] sm:$0xc] }
  0x5f   : > { %v5605_v20 = vcombine.low %v2604_v7, %v5594_v10 }
  0x61   : > { %4413 = vmatmul.mubr.msk.bf16.gmra.mrb[28].mxu1 %vm638_vm3, %v621_v17  ;;  %v2331_v17 = vsel %vm2296_vm5, %v2328_v5, %v2330_v6 }
  0x62   : > { %4416 = vmatprep.mubr.msk.bf16.mxu1 %vm638_vm3, %v629_v26  ;;  %v2332_v26 = vrot.slane %v5601_v15, 2 }
  0x64   : > { %v2333_v43 = vsel %vm2296_vm5, %v2330_v6, %v2332_v26  ;;  %v5669_v6 = vld [vmem:[#allocation2 + $0x50] sm:$0xff]   ;;  %v5673_v26 = vld [vmem:[#allocation2 + $0x58] sm:$0xff]  }
  0x65   : > { %4583 = vmatmul.mubr.msk.bf16.gmra.mrb[8].mxu0 %vm638_vm3, %v2309_v39  ;;  %v2736_v39 = vrot.slane %v5605_v20, 2 }
  0x66   : > { %4586 = vmatprep.mubr.msk.bf16.mxu0 %vm638_vm3, %v2311_v32  ;;  %v5619_v32 = vld [vmem:[#allocation2 + $0x20] sm:$0xff]  }
  0x69   : > { %4417 = vmatmul.mubr.msk.bf16.gmra.mrb[32].mxu1 %vm638_vm3, %v637_v30  ;;  %v2738_v30 = vsel %vm2296_vm5, %v2736_v39, %v2737_v27 }
  0x6a   : > { %4422 = vmatprep.mubr.msk.bf16.mxu1 %vm638_vm3, %v5251_v24  ;;  %v2317_v24 = vsel %vm2296_vm5, %v2314_v33, %v2316_v45  ;;  %v2739_v33 = vrot.slane %v5619_v32, 2  ;;  %v5633_v45 = vld [vmem:[#allocation2 + $0x30] sm:$0xff]  }
  0x6d   : > { %4587 = vmatmul.mubr.msk.bf16.gmra.mrb[12].mxu0 %vm638_vm3, %v2313_v35  ;;  %v2741_v35 = vrot.slane %v5622_v31, 2 }
  0x6e   : > { %4590 = vmatprep.mubr.msk.bf16.mxu0 %vm638_vm3, %v2315_v44  ;;  %v2740_v44 = vsel %vm2296_vm5, %v2737_v27, %v2739_v33  ;;  %v2753_v27 = vrot.slane %v5673_v26, 2 }
  0x6f   : > { %v2742_v58 = vsel %vm2296_vm5, %v2739_v33, %v2741_v35 }
  0x71   : > { %4423 = vmatmul.mubr.msk.bf16.vlgmr.msra.gmra.mrb[0].mxu1 %vm638_vm3, %v5257_v28 }
  0x72   : > { %4426 = vmatprep.mubr.msk.bf16.mxu1 %vm638_vm3, %v5276_v42  ;;  %4459 = vmatpush3.bf16.msra.mxu1 %v1189_v52  ;;  %v5638_v52 = vld [vmem:[#allocation2 + $0x38] sm:$0xff]  }
  0x73   : > { %5017 = vmatprep.subr.msk.bf16.mxu1 %vm693_vm1, %v5548_v18  ;;  %v2745_v21 = vrot.slane %v5638_v52, 2 }
  0x75   : > { %4591 = vmatmul.mubr.msk.bf16.gmra.mrb[16].mxu0 %vm638_vm3, %v2317_v24  ;;  %v5641_v24 = vld [vmem:[%s5207_s27 + $0x20] sm:$0xf]  ;;  %v2748_v5 = vsel %vm2296_vm5, %v2745_v21, %v2747_v63 }
  0x76   : > { %4594 = vmatprep.mubr.msk.bf16.mxu0 %vm638_vm3, %v2319_v53  ;;  %v2743_v53 = vrot.slane %v5633_v45, 2 }
  0x78   : > { %v2744_v11 = vsel %vm2296_vm5, %v2741_v35, %v2743_v53  ;;  %v1102_v35 = vrot.slane %v5282_v47, 1 }
  0x79   : > { %4427 = vmatmul.mubr.msk.bf16.gmra.mrb[4].mxu1 %vm638_vm3, %v5282_v47 }
  0x7a   : > { %4430 = vmatprep.mubr.msk.bf16.mxu1 %vm638_vm3, %v5289_v57 }
  0x7d   : > { %4595 = vmatmul.mubr.msk.bf16.gmra.mrb[20].mxu0 %vm638_vm3, %v2321_v38  ;;  %v2746_v38 = vsel %vm2296_vm5, %v2743_v53, %v2745_v21  ;;  %v1628_v21 = vsel %vm693_vm1, %v5548_v18, 0 }
  0x7e   : > { %4598 = vmatprep.mubr.msk.bf16.mxu0 %vm638_vm3, %v2323_v56  ;;  %v5657_v56 = vld [vmem:[#allocation2 + $0x48] sm:$0xff]  }
  0x81   : > { %4431 = vmatmul.mubr.msk.bf16.gmra.mrb[8].mxu1 %vm638_vm3, %v5298_v3 }
  0x82   : > { %4434 = vmatprep.mubr.msk.bf16.mxu1 %vm638_vm3, %v5310_v19 }
  0x85   : > { %4599 = vmatmul.mubr.msk.bf16.gmra.mrb[24].mxu0 %vm638_vm3, %v2325_v62  ;;  %v2749_v62 = vrot.slane %v5657_v56, 2 }
  0x86   : > { %4602 = vmatprep.mubr.msk.bf16.mxu0 %vm638_vm3, %v2327_v13  ;;  %v4032_v13 = vcombine.low %v1090_v59, %v5245_v22  ;;  %v2751_v22 = vrot.slane %v5669_v6, 2 }
  0x87   : > { %v2750_v7 = vsel %vm2296_vm5, %v2747_v63, %v2749_v62  ;;  %v1106_v63 = vrot.slane %v5298_v3, 1 }
  0x88   : > { %v2754_v33 = vsel %vm2296_vm5, %v2751_v22, %v2753_v27 }
  0x89   : > { %4435 = vmatmul.mubr.msk.bf16.gmra.mrb[12].mxu1 %vm638_vm3, %v5328_v50 }
  0x8a   : > { %4438 = vmatprep.mubr.msk.bf16.mxu1 %vm638_vm3, %v5385_v37 }
  0x8d   : > { %4603 = vmatmul.mubr.msk.bf16.gmra.mrb[28].mxu0 %vm638_vm3, %v2329_v12  ;;  %v1097_v12 = vrot.slane %v4032_v13, 1  ;;  %v5111_v13 = vld [vmem:[%s5207_s27 + $0x10] sm:$0xf] }
  0x8e   : > { %4606 = vmatprep.mubr.msk.bf16.mxu0 %vm638_vm3, %v2331_v17  ;;  %v1098_v17 = vrot.slane %v5257_v28, 1  ;;  %v1100_v28 = vrot.slane %v5276_v42, 1 }
  0x90   : > { %v1099_v39 = vsel %vm1096_vm6, %v1097_v12, %v1098_v17  ;;  %v1103_v53 = vsel %vm1096_vm6, %v1100_v28, %v1102_v35  ;;  %v1108_v12 = vrot.slane %v5310_v19, 1 }
  0x91   : > { %4439 = vmatmul.mubr.msk.bf16.gmra.mrb[16].mxu1 %vm638_vm3, %v5395_v51 }
  0x92   : > { %4442 = vmatprep.mubr.msk.bf16.mxu1 %vm638_vm3, %v5403_v61 }
  0x95   : > { %4607 = vmatmul.mubr.msk.bf16.gmra.mrb[32].mxu0 %vm638_vm3, %v2333_v43  ;;  %v2752_v43 = vsel %vm2296_vm5, %v2749_v62, %v2751_v22  ;;  %v5707_v62 = vld [vmem:[#allocation2 + $0x78] sm:$0xff]  }
  0x96   : > { %4612 = vmatprep.mubr.msk.bf16.mxu0 %vm638_vm3, %v2738_v30  ;;  %v5685_v30 = vld [vmem:[#allocation2 + $0x60] sm:$0xff]  }
  0x99   : > { %4443 = vmatmul.mubr.msk.bf16.gmra.mrb[20].mxu1 %vm638_vm3, %v5415_v14 }
  0x9a   : > { %4446 = vmatprep.mubr.msk.bf16.mxu1 %vm638_vm3, %v5420_v25 }
  0x9d   : > { %4613 = vmatmul.mubr.msk.bf16.vlgmr.msra.gmra.mrb[0].mxu0 %vm638_vm3, %v2740_v44  ;;  %v5689_v44 = vld [vmem:[#allocation2 + $0x68] sm:$0xff]  }
  0x9e   : > { %4649 = vmatpush3.bf16.msra.mxu0 %v3275_v48  ;;  %4616 = vmatprep.mubr.msk.bf16.mxu0 %vm638_vm3, %v2742_v58  ;;  %v1101_v48 = vsel %vm1096_vm6, %v1098_v17, %v1100_v28  ;;  %v2755_v58 = vrot.slane %v5685_v30, 2  ;;  %v2757_v42 = vrot.slane %v5689_v44, 2  ;;  %v5721_v17 = vld [vmem:[#allocation2 + $0x80] sm:$0xff]  }
  0x9f   : > { %5023 = vmatprep.subr.msk.bf16.mxu0 %vm693_vm1, %v5641_v24  ;;  %v2763_v28 = vrot.slane %v5721_v17, 2 }
  0xa0   : > { %v2756_v47 = vsel %vm2296_vm5, %v2753_v27, %v2755_v58  ;;  %v2758_v59 = vsel %vm2296_vm5, %v2755_v58, %v2757_v42  ;;  %v5725_v27 = vld [vmem:[#allocation2 + $0x88] sm:$0xff]   ;;  %v1114_v58 = vrot.slane %v5395_v51, 1  ;;  %v3054_v51 = vshll.u32 %v5605_v20, 16 }
  0xa1   : > { %4447 = vmatmul.mubr.msk.bf16.gmra.mrb[24].mxu1 %vm638_vm3, %v5428_v41  ;;  %v2765_v19 = vrot.slane %v5725_v27, 2 }
  0xa2   : > { %4450 = vmatprep.mubr.msk.bf16.mxu1 %vm638_vm3, %v5444_v4 }
  0xa5   : > { %4617 = vmatmul.mubr.msk.bf16.gmra.mrb[4].mxu0 %vm638_vm3, %v2744_v11  ;;  %v1104_v11 = vrot.slane %v5289_v57, 1 }
  0xa6   : > { %4620 = vmatprep.mubr.msk.bf16.mxu0 %vm638_vm3, %v2746_v38  ;;  %v5703_v38 = vld [vmem:[#allocation2 + $0x70] sm:$0xff]  }
  0xa7   : > { %v1105_v18 = vsel %vm1096_vm6, %v1102_v35, %v1104_v11  ;;  %v2759_v57 = vrot.slane %v5703_v38, 2 }
  0xa9   : > { %4451 = vmatmul.mubr.msk.bf16.gmra.mrb[28].mxu1 %vm638_vm3, %v5477_v29  ;;  %v2760_v3 = vsel %vm2296_vm5, %v2757_v42, %v2759_v57  ;;  %v5741_v42 = vld [vmem:[#allocation2 + $0x98] sm:$0xff]  }
  0xaa   : > { %4454 = vmatprep.mubr.msk.bf16.mxu1 %vm638_vm3, %v5480_v40 }
  0xad   : > { %4621 = vmatmul.mubr.msk.bf16.gmra.mrb[8].mxu0 %vm638_vm3, %v2748_v5  ;;  %v1107_v5 = vsel %vm1096_vm6, %v1104_v11, %v1106_v63 }
  0xae   : > { %4624 = vmatprep.mubr.msk.bf16.mxu0 %vm638_vm3, %v2750_v7  ;;  %v2761_v7 = vrot.slane %v5707_v62, 2 }
  0xb0   : > { %v2762_v22 = vsel %vm2296_vm5, %v2759_v57, %v2761_v7  ;;  %v2764_v35 = vsel %vm2296_vm5, %v2761_v7, %v2763_v28  ;;  %v1118_v7 = vrot.slane %v5415_v14, 1 }
  0xb1   : > { %4455 = vmatmul.mubr.msk.bf16.gmra.mrb[32].mxu1 %vm638_vm3, %v5487_v49 }
  0xb2   : > { %4460 = vmatprep.mubr.msk.bf16.mxu1 %vm638_vm3, %v1099_v39  ;;  %v1110_v39 = vrot.slane %v5328_v50, 1  ;;  %v1112_v50 = vrot.slane %v5385_v37, 1  ;;  %v3051_v37 = vshrl.u32 %v5605_v20, 16 }
  0xb4   : > { %v1115_v11 = vsel %vm1096_vm6, %v1112_v50, %v1114_v58 }
  0xb5   : > { %4625 = vmatmul.mubr.msk.bf16.gmra.mrb[12].mxu0 %vm638_vm3, %v2752_v43  ;;  %v1109_v43 = vsel %vm1096_vm6, %v1106_v63, %v1108_v12  ;;  %v3059_v63 = vshrl.u32 %v5607_v23, 16 }
  0xb6   : > { %4628 = vmatprep.mubr.msk.bf16.mxu0 %vm638_vm3, %v2754_v33  ;;  %v1111_v33 = vsel %vm1096_vm6, %v1108_v12, %v1110_v39 }
  0xb7   : > { %v3061_v20 = vrot.slane %v3059_v63, 2 }
  0xb9   : > { %4461 = vmatmul.mubr.msk.bf16.vlgmr.msra.gmra.mrb[0].mxu1 %vm638_vm3, %v1101_v48  ;;  %v5737_v48 = vld [vmem:[#allocation2 + $0x90] sm:$0xff]  }
  0xba   : > { %4464 = vmatprep.mubr.msk.bf16.mxu1 %vm638_vm3, %v1103_v53  ;;  %4497 = vmatpush3.bf16.msra.mxu1 %v1628_v21  ;;  %v2766_v53 = vsel %vm2296_vm5, %v2763_v28, %v2765_v19  ;;  %v1113_v21 = vsel %vm1096_vm6, %v1110_v39, %v1112_v50  ;;  %v3077_v50 = vshrl.u32 %v5622_v31, 16 }
  0xbb   : > { %5019 = vmatprep.subr.msk.bf16.mxu1 %vm693_vm1, %v5111_v13  ;;  %v3062_v13 = vshll.u32 %v5607_v23, 16 }
  0xbc   : > { %v3079_v63 = vrot.slane %v3077_v50, 2 }
  0xbd   : > { %4629 = vmatmul.mubr.msk.bf16.gmra.mrb[16].mxu0 %vm638_vm3, %v2756_v47  ;;  %v2767_v47 = vrot.slane %v5737_v48, 2  ;;  %v3064_v39 = vrot.slane %v3062_v13, 3 }
  0xbe   : > { %4632 = vmatprep.mubr.msk.bf16.mxu0 %vm638_vm3, %v2758_v59  ;;  %v2769_v59 = vrot.slane %v5741_v42, 2 }
  0xbf   : > { %v2768_v57 = vsel %vm2296_vm5, %v2765_v19, %v2767_v47  ;;  %v3071_v19 = vshll.u32 %v5619_v32, 16 }
  0xc0   : > { %v2770_v12 = vsel %vm2296_vm5, %v2767_v47, %v2769_v59 }
  0xc1   : > { %4465 = vmatmul.mubr.msk.bf16.gmra.mrb[4].mxu1 %vm638_vm3, %v1105_v18  ;;  %v1116_v18 = vrot.slane %v5403_v61, 1 }
  0xc2   : > { %4468 = vmatprep.mubr.msk.bf16.mxu1 %vm638_vm3, %v1107_v5  ;;  %v5108_v5 = vld [vmem:[#allocation2 + $0xa0] ss:$0 sps:$4 sm:$0x33]  }
  0xc3   : > { %v2771_v61 = vrot.slane %v5108_v5, 2  ;;  %v1119_v28 = vsel %vm1096_vm6, %v1116_v18, %v1118_v7  ;;  %v3089_v5 = vshll.u32 %v5633_v45, 16 }
  0xc5   : > { %4633 = vmatmul.mubr.msk.bf16.gmra.mrb[20].mxu0 %vm638_vm3, %v2760_v3  ;;  %v3053_v3 = vrot.slane %v3051_v37, 2 }
  0xc6   : > { %4636 = vmatprep.mubr.msk.bf16.mxu0 %vm638_vm3, %v2762_v22  ;;  %v3056_v22 = vrot.slane %v3054_v51, 3  ;;  %v1122_v51 = vrot.slane %v5428_v41, 1  ;;  %v3098_v41 = vshll.u32 %v5638_v52, 16 }
  0xc8   : > { %v3057_v14 = vor.u32 %v3056_v22, %v3053_v3  ;;  %v3589_v22 = vsel %vm693_vm1, %v5641_v24, 0 }
  0xc9   : > { %4469 = vmatmul.mubr.msk.bf16.gmra.mrb[8].mxu1 %vm638_vm3, %v1109_v43  ;;  %v1117_v43 = vsel %vm1096_vm6, %v1114_v58, %v1116_v18  ;;  %v2772_v58 = vsel %vm2296_vm5, %v2769_v59, %v2771_v61  ;;  %v3086_v59 = vshrl.u32 %v5633_v45, 16 }
  0xca   : > { %4472 = vmatprep.mubr.msk.bf16.mxu1 %vm638_vm3, %v1111_v33  ;;  %v3068_v33 = vshrl.u32 %v5619_v32, 16 }
  0xcc   : > { %v3070_v47 = vrot.slane %v3068_v33, 2 }
  0xcd   : > { %4637 = vmatmul.mubr.msk.bf16.gmra.mrb[24].mxu0 %vm638_vm3, %v2764_v35  ;;  %v3065_v35 = vor.u32 %v3064_v39, %v3061_v20  ;;  %v3088_v39 = vrot.slane %v3086_v59, 2 }
  0xce   : > { %4640 = vmatprep.mubr.msk.bf16.mxu0 %vm638_vm3, %v2766_v53  ;;  %v3080_v53 = vshll.u32 %v5622_v31, 16 }
  0xcf   : > { %v3066_v37 = vsel %vm3049_vm7, %v3057_v14, %v3065_v35 }
  0xd0   : > { %v3082_v13 = vrot.slane %v3080_v53, 3 }
  0xd1   : > { %4473 = vmatmul.mubr.msk.bf16.gmra.mrb[12].mxu1 %vm638_vm3, %v1113_v21  ;;  %v1120_v21 = vrot.slane %v5420_v25, 1 }
  0xd2   : > { %4476 = vmatprep.mubr.msk.bf16.mxu1 %vm638_vm3, %v1115_v11  ;;  %v3073_v11 = vrot.slane %v3071_v19, 3  ;;  %v3083_v3 = vor.u32 %v3082_v13, %v3079_v63  ;;  %v3100_v19 = vrot.slane %v3098_v41, 3  ;;  %v1130_v63 = vrot.slane %v5487_v49, 1 }
  0xd3   : > { %v1121_v18 = vsel %vm1096_vm6, %v1118_v7, %v1120_v21  ;;  %v1123_v25 = vsel %vm1096_vm6, %v1120_v21, %v1122_v51  ;;  %v1124_v7 = vrot.slane %v5444_v4, 1  ;;  %v3107_v4 = vshll.u32 %v5654_v55, 16 }
  0xd4   : > { %v3134_v49 = vshll.u32 %v5673_v26, 16  ;;  %v1132_v41 = vrot.slane %v5504_v1, 1 }
  0xd5   : > { %4641 = vmatmul.mubr.msk.bf16.gmra.mrb[28].mxu0 %vm638_vm3, %v2768_v57  ;;  %v3074_v57 = vor.u32 %v3073_v11, %v3070_v47  ;;  %v1125_v24 = vsel %vm1096_vm6, %v1122_v51, %v1124_v7  ;;  %v1128_v47 = vrot.slane %v5480_v40, 1 }
  0xd6   : > { %4644 = vmatprep.mubr.msk.bf16.mxu0 %vm638_vm3, %v2770_v12  ;;  %v3095_v12 = vshrl.u32 %v5638_v52, 16  ;;  %v1133_v1 = vsel %vm1096_vm6, %v1130_v63, %v1132_v41 }
  0xd7   : > { %v3075_v20 = vsel %vm3049_vm7, %v3065_v35, %v3074_v57  ;;  %v3084_v61 = vsel %vm3049_vm7, %v3074_v57, %v3083_v3  ;;  %v3104_v35 = vshrl.u32 %v5654_v55, 16  ;;  %v1131_v40 = vsel %vm1096_vm6, %v1128_v47, %v1130_v63 }
  0xd8   : > { %v3097_v33 = vrot.slane %v3095_v12, 2  ;;  %v3131_v12 = vshrl.u32 %v5673_v26, 16 }
  0xd9   : > { %4477 = vmatmul.mubr.msk.bf16.gmra.mrb[16].mxu1 %vm638_vm3, %v1117_v43  ;;  %v3091_v43 = vrot.slane %v3089_v5, 3  ;;  %v3106_v11 = vrot.slane %v3104_v35, 2  ;;  %v3122_v5 = vshrl.u32 %v5669_v6, 16  ;;  %v3143_v35 = vshll.u32 %v5685_v30, 16 }
  0xda   : > { %4480 = vmatprep.mubr.msk.bf16.mxu1 %vm638_vm3, %v1119_v28  ;;  %v1126_v28 = vrot.slane %v5477_v29, 1  ;;  %v3101_v53 = vor.u32 %v3100_v19, %v3097_v33  ;;  %v3116_v29 = vshll.u32 %v5657_v56, 16  ;;  %v3133_v33 = vrot.slane %v3131_v12, 2 }
  0xdb   : > { %v3092_v14 = vor.u32 %v3091_v43, %v3088_v39  ;;  %v1536_v39 = vrot.slane %v5270_v36, 1  ;;  %v3136_v19 = vrot.slane %v3134_v49, 3  ;;  %v3167_v12 = vshrl.u32 %v5707_v62, 16 }
  0xdc   : > { %v1127_v50 = vsel %vm1096_vm6, %v1124_v7, %v1126_v28  ;;  %v1129_v57 = vsel %vm1096_vm6, %v1126_v28, %v1128_v47  ;;  %v3170_v49 = vshll.u32 %v5707_v62, 16 }
  0xdd   : > { %4645 = vmatmul.mubr.msk.bf16.gmra.mrb[32].mxu0 %vm638_vm3, %v2772_v58  ;;  %v3113_v58 = vshrl.u32 %v5657_v56, 16  ;;  %v3093_v21 = vsel %vm3049_vm7, %v3083_v3, %v3092_v14  ;;  %v3102_v51 = vsel %vm3049_vm7, %v3092_v14, %v3101_v53  ;;  %v3140_v14 = vshrl.u32 %v5685_v30, 16 }
  0xde   : > { %4650 = vmatprep.mubr.msk.bf16.mxu0 %vm638_vm3, %v3066_v37  ;;  %v3109_v37 = vrot.slane %v3107_v4, 3  ;;  %v3137_v36 = vor.u32 %v3136_v19, %v3133_v33  ;;  %v3169_v33 = vrot.slane %v3167_v12, 2  ;;  %v3172_v19 = vrot.slane %v3170_v49, 3 }
  0xdf   : > { %v3115_v13 = vrot.slane %v3113_v58, 2  ;;  %v3142_v47 = vrot.slane %v3140_v14, 2  ;;  %v3176_v14 = vshrl.u32 %v5721_v17, 16  ;;  %v3206_v12 = vshll.u32 %v5741_v42, 16 }
  0xe0   : > { %v3110_v59 = vor.u32 %v3109_v37, %v3106_v11  ;;  %v3145_v11 = vrot.slane %v3143_v35, 3  ;;  %v3179_v35 = vshll.u32 %v5721_v17, 16 }
  0xe1   : > { %4481 = vmatmul.mubr.msk.bf16.gmra.mrb[20].mxu1 %vm638_vm3, %v1121_v18  ;;  %v3118_v18 = vrot.slane %v3116_v29, 3  ;;  %v5113_v29 = vld [vmem:[#allocation2 + $0x18] sm:$0xff]  }
  0xe2   : > { %4484 = vmatprep.mubr.msk.bf16.mxu1 %vm638_vm3, %v1123_v25  ;;  %v3125_v25 = vshll.u32 %v5669_v6, 16 }
  0xe3   : > { %v3119_v3 = vor.u32 %v3118_v18, %v3115_v13 }
  0xe4   : > { %v3127_v7 = vrot.slane %v3125_v25, 3  ;;  %v3161_v25 = vshll.u32 %v5703_v38, 16 }
  0xe5   : > { %4651 = vmatmul.mubr.msk.bf16.vlgmr.msra.gmra.mrb[0].mxu0 %vm638_vm3, %v3075_v20  ;;  %v3124_v20 = vrot.slane %v3122_v5, 2  ;;  %v3120_v43 = vsel %vm3049_vm7, %v3110_v59, %v3119_v3  ;;  %v3158_v5 = vshrl.u32 %v5703_v38, 16 }
  0xe6   : > { %4687 = vmatpush3.bf16.msra.mxu0 %v3589_v22  ;;  %4654 = vmatprep.mubr.msk.bf16.mxu0 %vm638_vm3, %v3084_v61  ;;  %v3111_v22 = vsel %vm3049_vm7, %v3101_v53, %v3110_v59  ;;  %v5112_v61 = vld [vmem:[#allocation2 + $0x10] sm:$0xff]   ;;  %v3152_v53 = vshll.u32 %v5689_v44, 16  ;;  %v3146_v59 = vor.u32 %v3145_v11, %v3142_v47  ;;  %v3181_v47 = vrot.slane %v3179_v35, 3 }
  0xe7   : > { %v1537_v28 = vrot.slane %v5112_v61, 1  ;;  %v5116_v61 = vld [vmem:[#allocation2 + $0x30] sm:$0xff]  }
  0xe8   : > { %v3154_v18 = vrot.slane %v3152_v53, 3  ;;  %v3147_v41 = vsel %vm3049_vm7, %v3137_v36, %v3146_v59 }
  0xe9   : > { %4485 = vmatmul.mubr.msk.bf16.gmra.mrb[24].mxu1 %vm638_vm3, %v1125_v24  ;;  %v3128_v24 = vor.u32 %v3127_v7, %v3124_v20  ;;  %v1538_v4 = vsel %vm1096_vm6, %v1536_v39, %v1537_v28  ;;  %v3160_v7 = vrot.slane %v3158_v5, 2  ;;  %v3163_v39 = vrot.slane %v3161_v25, 3 }
  0xea   : > { %4488 = vmatprep.mubr.msk.bf16.mxu1 %vm638_vm3, %v1127_v50  ;;  %v3149_v50 = vshrl.u32 %v5689_v44, 16  ;;  %v3197_v5 = vshll.u32 %v5737_v48, 16 }
  0xeb   : > { %v3129_v58 = vsel %vm3049_vm7, %v3119_v3, %v3128_v24  ;;  %v3138_v37 = vsel %vm3049_vm7, %v3128_v24, %v3137_v36  ;;  %v3164_v24 = vor.u32 %v3163_v39, %v3160_v7  ;;  %v3185_v36 = vshrl.u32 %v5725_v27, 16  ;;  %v5865_v39 = vld [vmem:[#allocation2 + $0xa0] ss:$0 sps:$4 sm:$0x77]  }
  0xec   : > { %v3151_v13 = vrot.slane %v3149_v50, 2  ;;  %v3188_v50 = vshll.u32 %v5725_v27, 16  ;;  %v3199_v7 = vrot.slane %v3197_v5, 3  ;;  %v3215_v35 = vshll.u32 %v5865_v39, 16 }
  0xed   : > { %4655 = vmatmul.mubr.msk.bf16.gmra.mrb[4].mxu0 %vm638_vm3, %v3093_v21  ;;  %v1539_v21 = vrot.slane %v5113_v29, 1 }
  0xee   : > { %4658 = vmatprep.mubr.msk.bf16.mxu0 %vm638_vm3, %v3102_v51  ;;  %v5114_v51 = vld [vmem:[#allocation2 + $0x20] sm:$0xff]   ;;  %v3155_v3 = vor.u32 %v3154_v18, %v3151_v13  ;;  %v3190_v13 = vrot.slane %v3188_v50, 3 }
  0xef   : > { %v1541_v63 = vrot.slane %v5114_v51, 1 }
  0xf0   : > { %v3165_v53 = vsel %vm3049_vm7, %v3155_v3, %v3164_v24 }
  0xf1   : > { %4489 = vmatmul.mubr.msk.bf16.gmra.mrb[28].mxu1 %vm638_vm3, %v1129_v57  ;;  %v1540_v57 = vsel %vm1096_vm6, %v1537_v28, %v1539_v21  ;;  %v1545_v28 = vrot.slane %v5116_v61, 1  ;;  %v5120_v61 = vld [vmem:[#allocation2 + $0x50] sm:$0xff]  }
  0xf2   : > { %4492 = vmatprep.mubr.msk.bf16.mxu1 %vm638_vm3, %v1131_v40  ;;  %v1542_v40 = vsel %vm1096_vm6, %v1539_v21, %v1541_v63  ;;  %v3178_v21 = vrot.slane %v3176_v14, 2  ;;  %v3212_v14 = vshrl.u32 %v5865_v39, 16 }
  0xf5   : > { %4659 = vmatmul.mubr.msk.bf16.gmra.mrb[8].mxu0 %vm638_vm3, %v3111_v22  ;;  %v5115_v22 = vld [vmem:[#allocation2 + $0x28] sm:$0xff]  }
  0xf6   : > { %4662 = vmatprep.mubr.msk.bf16.mxu0 %vm638_vm3, %v3120_v43  ;;  %v1543_v20 = vrot.slane %v5115_v22, 1  ;;  %v3156_v43 = vsel %vm3049_vm7, %v3146_v59, %v3155_v3  ;;  %v3194_v59 = vshrl.u32 %v5737_v48, 16  ;;  %v3203_v3 = vshrl.u32 %v5741_v42, 16 }
  0xf9   : > { %4493 = vmatmul.mubr.msk.bf16.gmra.mrb[32].mxu1 %vm638_vm3, %v1133_v1  ;;  %v1544_v1 = vsel %vm1096_vm6, %v1541_v63, %v1543_v20  ;;  %v3187_v63 = vrot.slane %v3185_v36, 2  ;;  %v3490_v36 = vld [vmem:[#allocation2 + $0x10] sm:$0x8] }
  0xfa   : > { %4498 = vmatprep.mubr.msk.bf16.mxu1 %vm638_vm3, %v1538_v4  ;;  %v3173_v4 = vor.u32 %v3172_v19, %v3169_v33  ;;  %v3205_v33 = vrot.slane %v3203_v3, 2  ;;  %v3208_v19 = vrot.slane %v3206_v12, 3  ;;  %v3502_v12 = vrot.slane %v5622_v31, 3 }
  0xfb   : > { %v3504_v31 = vrot.slane %v5633_v45, 3  ;;  %v1952_v45 = vshll.u32 %v5537_v46, 16 }
  0xfc   : > { %v3174_v11 = vsel %vm3049_vm7, %v3164_v24, %v3173_v4 }
  0xfd   : > { %4663 = vmatmul.mubr.msk.bf16.gmra.mrb[12].mxu0 %vm638_vm3, %v3129_v58  ;;  %v5117_v58 = vld [vmem:[#allocation2 + $0x38] sm:$0xff]  }
  0xfe   : > { %4666 = vmatprep.mubr.msk.bf16.mxu0 %vm638_vm3, %v3138_v37  ;;  %v1547_v29 = vrot.slane %v5117_v58, 1  ;;  %v5118_v37 = vld [vmem:[#allocation2 + $0x40] sm:$0xff]  }
  0xff   : > { %v1549_v51 = vrot.slane %v5118_v37, 1  ;;  %v4188_v37 = vcombine.low %v3490_v36, %v5594_v10  ;;  %v1559_v10 = vrot.slane %v5555_v8, 1  ;;  %v1954_v36 = vrot.slane %v1952_v45, 2 }
 0x100   : > { %v1548_v18 = vsel %vm1096_vm6, %v1545_v28, %v1547_v29 }
 0x101   : > { %4499 = vmatmul.mubr.msk.bf16.vlgmr.msra.gmra.mrb[0].mxu1 %vm638_vm3, %v1540_v57  ;;  %v3182_v57 = vor.u32 %v3181_v47, %v3178_v21  ;;  %v1550_v25 = vsel %vm1096_vm6, %v1547_v29, %v1549_v51  ;;  %v3214_v29 = vrot.slane %v3212_v14, 2  ;;  %v3217_v21 = vrot.slane %v3215_v35, 3  ;;  %v5110_v14 = vld [vmem:[#allocation2 + $0x98] ss:$0 sps:$4 sm:$0x11]  }
 0x102   : > { %4502 = vmatprep.mubr.msk.bf16.mxu1 %vm638_vm3, %v1542_v40  ;;  %4725 = vmatpush3.bf16.msra.mxu1 %v5221_v9  ;;  %v1546_v9 = vsel %vm1096_vm6, %v1543_v20, %v1545_v28  ;;  %v3191_v40 = vor.u32 %v3190_v13, %v3187_v63  ;;  %v3196_v20 = vrot.slane %v3194_v59, 2  ;;  %v1553_v28 = vrot.slane %v5120_v61, 1 }
 0x103   : > { %v3183_v49 = vsel %vm3049_vm7, %v3173_v4, %v3182_v57  ;;  %v3209_v4 = vor.u32 %v3208_v19, %v3205_v33  ;;  %v3218_v63 = vor.u32 %v3217_v21, %v3214_v29  ;;  %v3505_v61 = vsel %vm3496_vm8, %v3502_v12, %v3504_v31 }
 0x104   : > { %v3200_v24 = vor.u32 %v3199_v7, %v3196_v20  ;;  %v1565_v20 = vrot.slane %v5574_v16, 1  ;;  %v1569_v19 = vrot.slane %v5588_v2, 1  ;;  %v1967_v21 = vshrl.u32 %v5558_v54, 16 }
 0x105   : > { %4667 = vmatmul.mubr.msk.bf16.gmra.mrb[16].mxu0 %vm638_vm3, %v3147_v41  ;;  %v5119_v41 = vld [vmem:[#allocation2 + $0x48] sm:$0xff]   ;;  %v3219_v59 = vsel %vm3049_vm7, %v3209_v4, %v3218_v63  ;;  %v3514_v63 = vrot.slane %v5673_v26, 3  ;;  %v1988_v26 = vshll.u32 %v5574_v16, 16 }
 0x106   : > { %4670 = vmatprep.mubr.msk.bf16.mxu0 %vm638_vm3, %v3156_v43  ;;  %v1551_v22 = vrot.slane %v5119_v41, 1  ;;  %v3192_v43 = vsel %vm3049_vm7, %v3182_v57, %v3191_v40  ;;  %v3201_v50 = vsel %vm3049_vm7, %v3191_v40, %v3200_v24  ;;  %v3210_v47 = vsel %vm3049_vm7, %v3200_v24, %v3209_v4 }
 0x107   : > { %v3498_v57 = vrot.slane %v5607_v23, 3  ;;  %v3500_v23 = vrot.slane %v5619_v32, 3  ;;  %v1563_v41 = vrot.slane %v5571_v34, 1  ;;  %v3508_v24 = vrot.slane %v5654_v55, 3 }
 0x109   : > { %4503 = vmatmul.mubr.msk.bf16.gmra.mrb[4].mxu1 %vm638_vm3, %v1544_v1  ;;  %v1552_v1 = vsel %vm1096_vm6, %v1549_v51, %v1551_v22  ;;  %v1566_v7 = vsel %vm1096_vm6, %v1563_v41, %v1565_v20 }
 0x10a   : > { %4506 = vmatprep.mubr.msk.bf16.mxu1 %vm638_vm3, %v1546_v9  ;;  %v1554_v9 = vsel %vm1096_vm6, %v1551_v22, %v1553_v28  ;;  %v3503_v22 = vsel %vm3496_vm8, %v3500_v23, %v3502_v12 }
 0x10d   : > { %4671 = vmatmul.mubr.msk.bf16.gmra.mrb[20].mxu0 %vm638_vm3, %v3165_v53  ;;  %v5121_v53 = vld [vmem:[#allocation2 + $0x58] sm:$0xff]  }
 0x10e   : > { %4674 = vmatprep.mubr.msk.bf16.mxu0 %vm638_vm3, %v3174_v11  ;;  %v1555_v58 = vrot.slane %v5121_v53, 1  ;;  %v1557_v11 = vrot.slane %v5537_v46, 1  ;;  %v1958_v53 = vshrl.u32 %v5555_v8, 16 }
 0x110   : > { %v1556_v51 = vsel %vm1096_vm6, %v1553_v28, %v1555_v58  ;;  %v1558_v13 = vsel %vm1096_vm6, %v1555_v58, %v1557_v11  ;;  %v1560_v40 = vsel %vm1096_vm6, %v1557_v11, %v1559_v10  ;;  %v1567_v28 = vrot.slane %v5585_v0, 1 }
 0x111   : > { %4507 = vmatmul.mubr.msk.bf16.gmra.mrb[8].mxu1 %vm638_vm3, %v1548_v18  ;;  %v3497_v18 = vrot.slane %v4188_v37, 3  ;;  %v1961_v58 = vshll.u32 %v5555_v8, 16  ;;  %v3512_v11 = vrot.slane %v5669_v6, 3  ;;  %v1960_v37 = vrot.slane %v1958_v53, 1 }
 0x112   : > { %4510 = vmatprep.mubr.msk.bf16.mxu1 %vm638_vm3, %v1550_v25  ;;  %v1561_v25 = vrot.slane %v5558_v54, 1  ;;  %v1570_v35 = vsel %vm1096_vm6, %v1567_v28, %v1569_v19  ;;  %v1979_v6 = vshll.u32 %v5571_v34, 16 }
 0x113   : > { %v3499_v5 = vsel %vm3496_vm8, %v3497_v18, %v3498_v57 }
 0x114   : > { %v1562_v3 = vsel %vm1096_vm6, %v1559_v10, %v1561_v25  ;;  %v1564_v32 = vsel %vm1096_vm6, %v1561_v25, %v1563_v41  ;;  %v3515_v10 = vsel %vm3496_vm8, %v3512_v11, %v3514_v63  ;;  %v1990_v41 = vrot.slane %v1988_v26, 2 }
 0x115   : > { %4675 = vmatmul.mubr.msk.bf16.gmra.mrb[24].mxu0 %vm638_vm3, %v3183_v49  ;;  %v3501_v49 = vsel %vm3496_vm8, %v3498_v57, %v3500_v23 }
 0x116   : > { %4678 = vmatprep.mubr.msk.bf16.mxu0 %vm638_vm3, %v3192_v43  ;;  %v3506_v43 = vrot.slane %v5638_v52, 3  ;;  %v1568_v52 = vsel %vm1096_vm6, %v1565_v20, %v1567_v28  ;;  %v1994_v20 = vshrl.u32 %v5585_v0, 16 }
 0x118   : > { %v3507_v33 = vsel %vm3496_vm8, %v3504_v31, %v3506_v43  ;;  %v1996_v28 = vrot.slane %v1994_v20, 1 }
 0x119   : > { %4511 = vmatmul.mubr.msk.bf16.gmra.mrb[12].mxu1 %vm638_vm3, %v1552_v1  ;;  %v1949_v1 = vshrl.u32 %v5537_v46, 16  ;;  %v1571_v46 = vrot.slane %v5110_v14, 1  ;;  %v2015_v14 = vshll.u32 %v5601_v15, 16 }
 0x11a   : > { %4514 = vmatprep.mubr.msk.bf16.mxu1 %vm638_vm3, %v1554_v9  ;;  %v3510_v9 = vrot.slane %v5657_v56, 3  ;;  %v1970_v56 = vshll.u32 %v5558_v54, 16 }
 0x11b   : > { %v1951_v4 = vrot.slane %v1949_v1, 1 }
 0x11c   : > { %v3511_v55 = vsel %vm3496_vm8, %v3508_v24, %v3510_v9  ;;  %v1972_v18 = vrot.slane %v1970_v56, 2  ;;  %v3513_v54 = vsel %vm3496_vm8, %v3510_v9, %v3512_v11  ;;  %v3524_v9 = vrot.slane %v5721_v17, 3 }
 0x11d   : > { %4679 = vmatmul.mubr.msk.bf16.gmra.mrb[28].mxu0 %vm638_vm3, %v3201_v50  ;;  %v3509_v50 = vsel %vm3496_vm8, %v3506_v43, %v3508_v24  ;;  %v1955_v29 = vor.u32 %v1954_v36, %v1951_v4  ;;  %v2012_v24 = vshrl.u32 %v5601_v15, 16  ;;  %v2017_v36 = vrot.slane %v2015_v14, 2 }
 0x11e   : > { %4682 = vmatprep.mubr.msk.bf16.mxu0 %vm638_vm3, %v3210_v47  ;;  %v1572_v47 = vsel %vm1096_vm6, %v1569_v19, %v1571_v46  ;;  %v3526_v46 = vrot.slane %v5725_v27, 3  ;;  %v3532_v56 = vrot.slane %v5865_v39, 3 }
 0x11f   : > { %v1956_v8 = vsel %vm1849_vm4, %v5437_v60, %v1955_v29  ;;  %v1985_v60 = vshrl.u32 %v5574_v16, 16  ;;  %v2014_v4 = vrot.slane %v2012_v24, 1 }
 0x121   : > { %4515 = vmatmul.mubr.msk.bf16.gmra.mrb[16].mxu1 %vm638_vm3, %v1556_v51  ;;  %v1963_v51 = vrot.slane %v1961_v58, 2  ;;  %v2018_v53 = vor.u32 %v2017_v36, %v2014_v4  ;;  %v3527_v58 = vsel %vm3496_vm8, %v3524_v9, %v3526_v46 }
 0x122   : > { %4518 = vmatprep.mubr.msk.bf16.mxu1 %vm638_vm3, %v1558_v13  ;;  %v1969_v13 = vrot.slane %v1967_v21, 1 }
 0x123   : > { %v1964_v57 = vor.u32 %v1963_v51, %v1960_v37 }
 0x125   : > { %4683 = vmatmul.mubr.msk.bf16.gmra.mrb[32].mxu0 %vm638_vm3, %v3219_v59  ;;  %v1976_v59 = vshrl.u32 %v5571_v34, 16  ;;  %v1965_v25 = vsel %vm1849_vm4, %v1955_v29, %v1964_v57  ;;  %v3518_v34 = vrot.slane %v5689_v44, 3  ;;  %v2006_v44 = vshll.u32 %v5588_v2, 16 }
 0x126   : > { %4688 = vmatprep.mubr.msk.bf16.mxu0 %vm638_vm3, %v3499_v5  ;;  %v1973_v5 = vor.u32 %v1972_v18, %v1969_v13  ;;  %v3530_v29 = vrot.slane %v5741_v42, 3 }
 0x127   : > { %v1978_v23 = vrot.slane %v1976_v59, 1  ;;  %v2008_v45 = vrot.slane %v2006_v44, 2 }
 0x128   : > { %v1974_v12 = vsel %vm1849_vm4, %v1964_v57, %v1973_v5 }
 0x129   : > { %4519 = vmatmul.mubr.msk.bf16.gmra.mrb[20].mxu1 %vm638_vm3, %v1560_v40  ;;  %v3516_v40 = vrot.slane %v5685_v30, 3 }
 0x12a   : > { %4522 = vmatprep.mubr.msk.bf16.mxu1 %vm638_vm3, %v1562_v3  ;;  %v1981_v3 = vrot.slane %v1979_v6, 2 }
 0x12b   : > { %v3517_v16 = vsel %vm3496_vm8, %v3514_v63, %v3516_v40  ;;  %v3519_v30 = vsel %vm3496_vm8, %v3516_v40, %v3518_v34 }
 0x12d   : > { %4689 = vmatmul.mubr.msk.bf16.vlgmr.msra.gmra.mrb[0].mxu0 %vm638_vm3, %v3501_v49  ;;  %v1987_v49 = vrot.slane %v1985_v60, 1 }
 0x12e   : > { %4692 = vmatprep.mubr.msk.bf16.mxu0 %vm638_vm3, %v3503_v22  ;;  %v1982_v22 = vor.u32 %v1981_v3, %v1978_v23 }
 0x12f   : > { %v1991_v31 = vor.u32 %v1990_v41, %v1987_v49 }
 0x130   : > { %v1983_v43 = vsel %vm1849_vm4, %v1973_v5, %v1982_v22 }
 0x131   : > { %4523 = vmatmul.mubr.msk.bf16.gmra.mrb[24].mxu1 %vm638_vm3, %v1564_v32  ;;  %v1997_v32 = vshll.u32 %v5585_v0, 16  ;;  %v1992_v19 = vsel %vm1849_vm4, %v1982_v22, %v1991_v31  ;;  %v3522_v0 = vrot.slane %v5707_v62, 3 }
 0x132   : > { %4526 = vmatprep.mubr.msk.bf16.mxu1 %vm638_vm3, %v1566_v7  ;;  %v2003_v7 = vshrl.u32 %v5588_v2, 16 }
 0x133   : > { %v3525_v15 = vsel %vm3496_vm8, %v3522_v0, %v3524_v9 }
 0x134   : > { %v2005_v1 = vrot.slane %v2003_v7, 1 }
 0x135   : > { %4693 = vmatmul.mubr.msk.bf16.gmra.mrb[4].mxu0 %vm638_vm3, %v3505_v61  ;;  %v3520_v61 = vrot.slane %v5703_v38, 3 }
 0x136   : > { %4696 = vmatprep.mubr.msk.bf16.mxu0 %vm638_vm3, %v3507_v33  ;;  %v1999_v33 = vrot.slane %v1997_v32, 2 }
 0x137   : > { %v3521_v2 = vsel %vm3496_vm8, %v3518_v34, %v3520_v61  ;;  %v3523_v38 = vsel %vm3496_vm8, %v3520_v61, %v3522_v0 }
 0x139   : > { %4527 = vmatmul.mubr.msk.bf16.gmra.mrb[28].mxu1 %vm638_vm3, %v1568_v52  ;;  %v2000_v52 = vor.u32 %v1999_v33, %v1996_v28 }
 0x13a   : > { %4530 = vmatprep.mubr.msk.bf16.mxu1 %vm638_vm3, %v1570_v35  ;;  %v2009_v35 = vor.u32 %v2008_v45, %v2005_v1 }
 0x13b   : > { %v2001_v62 = vsel %vm1849_vm4, %v1991_v31, %v2000_v52 }
 0x13c   : > { %v2019_v17 = vsel %vm1849_vm4, %v2009_v35, %v2018_v53 }
 0x13d   : > { %4697 = vmatmul.mubr.msk.bf16.gmra.mrb[8].mxu0 %vm638_vm3, %v3509_v50  ;;  %v2010_v50 = vsel %vm1849_vm4, %v2000_v52, %v2009_v35 }
 0x13e   : > { %4700 = vmatprep.mubr.msk.bf16.mxu0 %vm638_vm3, %v3511_v55  ;;  %v3528_v55 = vrot.slane %v5737_v48, 3 }
 0x140   : > { %v3529_v27 = vsel %vm3496_vm8, %v3526_v46, %v3528_v55  ;;  %v3531_v21 = vsel %vm3496_vm8, %v3528_v55, %v3530_v29 }
 0x141   : > { %4531 = vmatmul.mubr.msk.bf16.gmra.mrb[32].mxu1 %vm638_vm3, %v1572_v47  ;;  %v3533_v47 = vsel %vm3496_vm8, %v3530_v29, %v3532_v56 }
 0x142   : > { %4556 = vmatprep.mubr.msk.bf16.mxu1 %vm638_vm3, %v1956_v8 }
 0x145   : > { %4701 = vmatmul.mubr.msk.bf16.gmra.mrb[12].mxu0 %vm638_vm3, %v3513_v54 }
 0x146   : > { %4704 = vmatprep.mubr.msk.bf16.mxu0 %vm638_vm3, %v3515_v10 }
 0x149   : > { %4557 = vmatmul.mubr.msk.bf16.vlgmr.msra.gmra.mrb[20].mxu1 %vm638_vm3, %v1965_v25 }
 0x14a   : > { %4560 = vmatprep.mubr.msk.bf16.mxu1 %vm638_vm3, %v1974_v12 }
 0x14d   : > { %4705 = vmatmul.mubr.msk.bf16.gmra.mrb[16].mxu0 %vm638_vm3, %v3517_v16 }
 0x14e   : > { %4708 = vmatprep.mubr.msk.bf16.mxu0 %vm638_vm3, %v3519_v30 }
 0x151   : > { %4561 = vmatmul.mubr.msk.bf16.gmra.mrb[24].mxu1 %vm638_vm3, %v1983_v43 }
 0x152   : > { %4564 = vmatprep.mubr.msk.bf16.mxu1 %vm638_vm3, %v1992_v19 }
 0x155   : > { %4709 = vmatmul.mubr.msk.bf16.gmra.mrb[20].mxu0 %vm638_vm3, %v3521_v2 }
 0x156   : > { %4712 = vmatprep.mubr.msk.bf16.mxu0 %vm638_vm3, %v3523_v38 }
 0x159   : > { %4565 = vmatmul.mubr.msk.bf16.gmra.mrb[28].mxu1 %vm638_vm3, %v2001_v62 }
 0x15a   : > { %4568 = vmatprep.mubr.msk.bf16.mxu1 %vm638_vm3, %v2010_v50 }
 0x15d   : > { %4713 = vmatmul.mubr.msk.bf16.gmra.mrb[24].mxu0 %vm638_vm3, %v3525_v15 }
 0x15e   : > { %4716 = vmatprep.mubr.msk.bf16.mxu0 %vm638_vm3, %v3527_v58 }
 0x161   : > { %4569 = vmatmul.mubr.msk.bf16.gmra.mrb[32].mxu1 %vm638_vm3, %v2019_v17 }
 0x165   : > { %4717 = vmatmul.mubr.msk.bf16.gmra.mrb[28].mxu0 %vm638_vm3, %v3529_v27 }
 0x166   : > { %4720 = vmatprep.mubr.msk.bf16.mxu0 %vm638_vm3, %v3531_v21 }
 0x16d   : > { %4721 = vmatmul.mubr.msk.bf16.gmra.mrb[32].mxu0 %vm638_vm3, %v3533_v47 }
 0x1d4   : > { %v4500_v11 = vpop.f32.mrb[0].mxu1 }
 0x1d5   : > { %v1664_v48 = vpop.f32.mrb[1].mxu1 }
 0x1d6   : > { %v4501_v37 = vpop.f32.mrb[2].mxu1 }
 0x1d7   : > { %v1667_v42 = vpop.f32.mrb[3].mxu1 }
 0x1dc   : > { %v4504_v51 = vpop.f32.mrb[4].mxu1 }
 0x1dd   : > { %v1680_v8 = vpop.f32.mrb[5].mxu1 }
 0x1de   : > { %v4505_v63 = vpop.f32.mrb[6].mxu1 }
 0x1df   : > { %v1683_v13 = vpop.f32.mrb[7].mxu1 }
 0x1e4   : > { %v4508_v18 = vpop.f32.mrb[8].mxu1 }
 0x1e5   : > { %v1696_v54 = vpop.f32.mrb[9].mxu1 }
 0x1e6   : > { %v4509_v57 = vpop.f32.mrb[10].mxu1 }
 0x1e7   : > { %v1699_v59 = vpop.f32.mrb[11].mxu1 }
 0x1ec   : > { %v4512_v6 = vpop.f32.mrb[12].mxu1 }
 0x1ed   : > { %v1712_v10 = vpop.f32.mrb[13].mxu1 }
 0x1ee   : > { %v4513_v39 = vpop.f32.mrb[14].mxu1 }
 0x1ef   : > { %v1715_v5 = vpop.f32.mrb[15].mxu1 }
 0x1f4   : > { %v4516_v60 = vpop.f32.mrb[16].mxu1 }
 0x1f5   : > { %v1728_v26 = vpop.f32.mrb[17].mxu1 }
 0x1f6   : > { %v4517_v25 = vpop.f32.mrb[18].mxu1 }
 0x1f7   : > { %v5995_v40 = vpop.f32.mrb[19].mxu1 }
 0x200   : > { %v4690_v23 = vpop.f32.mrb[0].mxu0 }
 0x201   : > { %v4726_v3 = vadd.f32 %v4690_v23, %v4500_v11  ;;  %v3625_v12 = vpop.f32.mrb[1].mxu0 }
 0x202   : > { %v4727_v34 = vadd.f32 %v3625_v12, %v1664_v48  ;;  %v4691_v49 = vpop.f32.mrb[2].mxu0 }
 0x203   : > { %3807 = vst.msk [vmem:[%s6001_s30 + $0x10] sm:$0xff] %vm3804_vm9, %v4726_v3  ;;  %v4728_v41 = vadd.f32 %v4691_v49, %v4501_v37  ;;  %v3628_v16 = vpop.f32.mrb[3].mxu0 }
 0x204   : > { %3805 = vst.msk [vmem:[%s6001_s30] sm:$0xff] %vm3804_vm9, %v4727_v34  ;;  %v4729_v22 = vadd.f32 %v3628_v16, %v1667_v42 }
 0x205   : > { %3808 = vst.msk [vmem:[%s6001_s30 + $0x18] sm:$0xff] %vm3804_vm9, %v4728_v41 }
 0x206   : > { %3806 = vst.msk [vmem:[%s6001_s30 + $0x8] sm:$0xff] %vm3804_vm9, %v4729_v22 }
 0x208   : > { %v4694_v20 = vpop.f32.mrb[4].mxu0 }
 0x209   : > { %v4730_v32 = vadd.f32 %v4694_v20, %v4504_v51  ;;  %v3641_v30 = vpop.f32.mrb[5].mxu0 }
 0x20a   : > { %v4731_v31 = vadd.f32 %v3641_v30, %v1680_v8  ;;  %v4695_v7 = vpop.f32.mrb[6].mxu0 }
 0x20b   : > { %3811 = vst.msk [vmem:[%s6001_s30 + $0x30] sm:$0xff] %vm3804_vm9, %v4730_v32  ;;  %v4732_v44 = vadd.f32 %v4695_v7, %v4505_v63  ;;  %v3644_v43 = vpop.f32.mrb[7].mxu0 }
 0x20c   : > { %3809 = vst.msk [vmem:[%s6001_s30 + $0x20] sm:$0xff] %vm3804_vm9, %v4731_v31  ;;  %v4733_v61 = vadd.f32 %v3644_v43, %v1683_v13 }
 0x20d   : > { %3812 = vst.msk [vmem:[%s6001_s30 + $0x38] sm:$0xff] %vm3804_vm9, %v4732_v44 }
 0x20e   : > { %3810 = vst.msk [vmem:[%s6001_s30 + $0x28] sm:$0xff] %vm3804_vm9, %v4733_v61 }
 0x210   : > { %v4698_v28 = vpop.f32.mrb[8].mxu0 }
 0x211   : > { %v4734_v33 = vadd.f32 %v4698_v28, %v4508_v18  ;;  %v3657_v19 = vpop.f32.mrb[9].mxu0 }
 0x212   : > { %v4735_v0 = vadd.f32 %v3657_v19, %v1696_v54  ;;  %v4699_v1 = vpop.f32.mrb[10].mxu0 }
 0x213   : > { %3815 = vst.msk [vmem:[%s6001_s30 + $0x50] sm:$0xff] %vm3804_vm9, %v4734_v33  ;;  %v4736_v45 = vadd.f32 %v4699_v1, %v4509_v57  ;;  %v3660_v2 = vpop.f32.mrb[11].mxu0 }
 0x214   : > { %3813 = vst.msk [vmem:[%s6001_s30 + $0x40] sm:$0xff] %vm3804_vm9, %v4735_v0  ;;  %v4737_v52 = vadd.f32 %v3660_v2, %v1699_v59 }
 0x215   : > { %3816 = vst.msk [vmem:[%s6001_s30 + $0x58] sm:$0xff] %vm3804_vm9, %v4736_v45 }
 0x216   : > { %3814 = vst.msk [vmem:[%s6001_s30 + $0x48] sm:$0xff] %vm3804_vm9, %v4737_v52 }
 0x218   : > { %v4702_v24 = vpop.f32.mrb[12].mxu0 }
 0x219   : > { %v4738_v14 = vadd.f32 %v4702_v24, %v4512_v6  ;;  %v3673_v38 = vpop.f32.mrb[13].mxu0 }
 0x21a   : > { %v4739_v35 = vadd.f32 %v3673_v38, %v1712_v10  ;;  %v4703_v62 = vpop.f32.mrb[14].mxu0 }
 0x21b   : > { %3819 = vst.msk [vmem:[%s6001_s30 + $0x70] sm:$0xff] %vm3804_vm9, %v4738_v14  ;;  %v4740_v9 = vadd.f32 %v4703_v62, %v4513_v39  ;;  %v3676_v4 = vpop.f32.mrb[15].mxu0 }
 0x21c   : > { %3817 = vst.msk [vmem:[%s6001_s30 + $0x60] sm:$0xff] %vm3804_vm9, %v4739_v35  ;;  %v4741_v36 = vadd.f32 %v3676_v4, %v1715_v5  ;;  %v4558_v50 = vpop.f32.mrb[20].mxu1 }
 0x21d   : > { %3820 = vst.msk [vmem:[%s6001_s30 + $0x78] sm:$0xff] %vm3804_vm9, %v4740_v9  ;;  %v2191_v46 = vpop.f32.mrb[21].mxu1 }
 0x21e   : > { %3818 = vst.msk [vmem:[%s6001_s30 + $0x68] sm:$0xff] %vm3804_vm9, %v4741_v36  ;;  %v4559_v15 = vpop.f32.mrb[22].mxu1 }
 0x21f   : > { %v2194_v53 = vpop.f32.mrb[23].mxu1 }
 0x220   : > { %v4706_v58 = vpop.f32.mrb[16].mxu0 }
 0x221   : > { %v4742_v17 = vadd.f32 %v4706_v58, %v4516_v60  ;;  %v3689_v55 = vpop.f32.mrb[17].mxu0 }
 0x222   : > { %v4743_v29 = vadd.f32 %v3689_v55, %v1728_v26  ;;  %v4707_v27 = vpop.f32.mrb[18].mxu0 }
 0x223   : > { %3823 = vst.msk [vmem:[%s6001_s30 + $0x90] sm:$0xff] %vm3804_vm9, %v4742_v17  ;;  %v4744_v21 = vadd.f32 %v4707_v27, %v4517_v25  ;;  %v3692_v56 = vpop.f32.mrb[19].mxu0 }
 0x224   : > { %3821 = vst.msk [vmem:[%s6001_s30 + $0x80] sm:$0xff] %vm3804_vm9, %v4743_v29  ;;  %v4745_v47 = vadd.f32 %v3692_v56, %v5995_v40  ;;  %v4562_v11 = vpop.f32.mrb[24].mxu1 }
 0x225   : > { %3824 = vst.msk [vmem:[%s6001_s30 + $0x98] sm:$0xff] %vm3804_vm9, %v4744_v21  ;;  %v2207_v48 = vpop.f32.mrb[25].mxu1 }
 0x226   : > { %3822 = vst.msk [vmem:[%s6001_s30 + $0x88] sm:$0xff] %vm3804_vm9, %v4745_v47  ;;  %v4563_v37 = vpop.f32.mrb[26].mxu1 }
 0x227   : > { %v2210_v42 = vpop.f32.mrb[27].mxu1 }
 0x228   : > { %v4710_v51 = vpop.f32.mrb[20].mxu0 }
 0x229   : > { %v4746_v8 = vadd.f32 %v4710_v51, %v4558_v50  ;;  %v3705_v63 = vpop.f32.mrb[21].mxu0 }
 0x22a   : > { %v4747_v13 = vadd.f32 %v3705_v63, %v2191_v46  ;;  %v4711_v18 = vpop.f32.mrb[22].mxu0 }
 0x22b   : > { %3827 = vst.msk [vmem:[%s6001_s30 + $0xb0] sm:$0xff] %vm3804_vm9, %v4746_v8  ;;  %v4748_v54 = vadd.f32 %v4711_v18, %v4559_v15  ;;  %v3708_v57 = vpop.f32.mrb[23].mxu0 }
 0x22c   : > { %3825 = vst.msk [vmem:[%s6001_s30 + $0xa0] sm:$0xff] %vm3804_vm9, %v4747_v13  ;;  %v4749_v59 = vadd.f32 %v3708_v57, %v2194_v53  ;;  %v4566_v6 = vpop.f32.mrb[28].mxu1 }
 0x22d   : > { %3828 = vst.msk [vmem:[%s6001_s30 + $0xb8] sm:$0xff] %vm3804_vm9, %v4748_v54  ;;  %v2223_v10 = vpop.f32.mrb[29].mxu1 }
 0x22e   : > { %3826 = vst.msk [vmem:[%s6001_s30 + $0xa8] sm:$0xff] %vm3804_vm9, %v4749_v59  ;;  %v4567_v39 = vpop.f32.mrb[30].mxu1 }
 0x22f   : > { %v2226_v5 = vpop.f32.mrb[31].mxu1 }
 0x230   : > { %v4714_v60 = vpop.f32.mrb[24].mxu0 }
 0x231   : > { %v4750_v26 = vadd.f32 %v4714_v60, %v4562_v11  ;;  %v3721_v25 = vpop.f32.mrb[25].mxu0 }
 0x232   : > { %v4751_v40 = vadd.f32 %v3721_v25, %v2207_v48  ;;  %v4715_v23 = vpop.f32.mrb[26].mxu0 }
 0x233   : > { %3831 = vst.msk [vmem:[%s6001_s30 + $0xd0] sm:$0xff] %vm3804_vm9, %v4750_v26  ;;  %v4752_v3 = vadd.f32 %v4715_v23, %v4563_v37  ;;  %v3724_v12 = vpop.f32.mrb[27].mxu0 }
 0x234   : > { %3829 = vst.msk [vmem:[%s6001_s30 + $0xc0] sm:$0xff] %vm3804_vm9, %v4751_v40  ;;  %v4753_v34 = vadd.f32 %v3724_v12, %v2210_v42  ;;  %v4570_v49 = vpop.f32.mrb[32].mxu1 }
 0x235   : > { %3832 = vst.msk [vmem:[%s6001_s30 + $0xd8] sm:$0xff] %vm3804_vm9, %v4752_v3  ;;  %v2239_v41 = vpop.f32.mrb[33].mxu1 }
 0x236   : > { %3830 = vst.msk [vmem:[%s6001_s30 + $0xc8] sm:$0xff] %vm3804_vm9, %v4753_v34  ;;  %v4571_v16 = vpop.f32.mrb[34].mxu1 }
 0x237   : > { %v2242_v22 = vpop.f32.mrb[35].mxu1 }
 0x238   : > { %v4718_v20 = vpop.f32.mrb[28].mxu0 }
 0x239   : > { %v4754_v32 = vadd.f32 %v4718_v20, %v4566_v6  ;;  %v3737_v30 = vpop.f32.mrb[29].mxu0 }
 0x23a   : > { %v4755_v31 = vadd.f32 %v3737_v30, %v2223_v10  ;;  %v4719_v7 = vpop.f32.mrb[30].mxu0 }
 0x23b   : > { %3835 = vst.msk [vmem:[%s6001_s30 + $0xf0] sm:$0xff] %vm3804_vm9, %v4754_v32  ;;  %v4756_v44 = vadd.f32 %v4719_v7, %v4567_v39  ;;  %v3740_v43 = vpop.f32.mrb[31].mxu0 }
 0x23c   : > { %3833 = vst.msk [vmem:[%s6001_s30 + $0xe0] sm:$0xff] %vm3804_vm9, %v4755_v31  ;;  %v4757_v61 = vadd.f32 %v3740_v43, %v2226_v5 }
 0x23d   : > { %3836 = vst.msk [vmem:[%s6001_s30 + $0xf8] sm:$0xff] %vm3804_vm9, %v4756_v44 }
 0x23e   : > { %3834 = vst.msk [vmem:[%s6001_s30 + $0xe8] sm:$0xff] %vm3804_vm9, %v4757_v61 }
 0x240   : > { %v4722_v28 = vpop.f32.mrb[32].mxu0 }
 0x241   : > { %v4758_v33 = vadd.f32 %v4722_v28, %v4570_v49  ;;  %v3753_v19 = vpop.f32.mrb[33].mxu0 }
 0x242   : > { %v4759_v0 = vadd.f32 %v3753_v19, %v2239_v41  ;;  %v4723_v1 = vpop.f32.mrb[34].mxu0 }
 0x243   : > { %3839 = vst.msk [vmem:[%s6001_s30 + $0x110] sm:$0xff] %vm3804_vm9, %v4758_v33  ;;  %v4760_v45 = vadd.f32 %v4723_v1, %v4571_v16  ;;  %v3756_v2 = vpop.f32.mrb[35].mxu0 }
 0x244   : > { %3837 = vst.msk [vmem:[%s6001_s30 + $0x100] sm:$0xff] %vm3804_vm9, %v4759_v0  ;;  %v4761_v52 = vadd.f32 %v3756_v2, %v2242_v22 }
 0x245   : > { %3840 = vst.msk [vmem:[%s6001_s30 + $0x118] sm:$0xff] %vm3804_vm9, %v4760_v45 }
 0x246   : > { %3838 = vst.msk [vmem:[%s6001_s30 + $0x108] sm:$0xff] %vm3804_vm9, %v4761_v52 }
 0x247 PF: > { %s13_s14 = sadd.s32 1, %s5144_s14   ;;  %s6089_s12 = smov %s5140_s13 }
 0x248   : > { %p10_p5 = scmp.ge.s32.totalorder %s13_s14, 4   ;;  %s6090_s13 = smov %s6092_s15 }
 0x24a   :  { %12 = sbr.rel (!%p10_p5) target bundleno = 2 (0x2), region = 76 }

</bundles_post_ra>
